<compile_context>
chip_gen: v5e
topology: v5e:2x2
jax: 0.10.0
libtpu: 0.0.40
codegen_flags: <defaults>
</compile_context>

<pallas_src>
import functools
from typing import NamedTuple

import numpy as np

import jax
import jax.numpy as jnp
from jax.experimental import pallas as pl
from jax.experimental.pallas import tpu as pltpu


class LayerCfg(NamedTuple):
    cin: int
    cout: int
    h: int      # spatial size entering the conv (== conv output size, "same" conv)
    w: int
    dil: int
    pool: int
    ho: int     # spatial size after MaxPool2d
    wo: int


# ----------------------------------------------------------------------------
# Kernel
# ----------------------------------------------------------------------------
def _fused_kernel(*refs, cfgs, batch):
    """Whole InnerGroupRelation forward for the full batch in one invocation."""
    eps = 1e-5

    # ---- unpack refs: inputs, output, scratch (order must match the wrapper).
    idx = 0
    x_ref = refs[idx]
    idx += 1
    layer_inputs = []
    for L in cfgs:
        w_ref, b_ref, tmask_ref, smask_ref = refs[idx:idx + 4]
        idx += 4
        s_ref = None
        if L.pool > 1:
            s_ref = refs[idx]
            idx += 1
        layer_inputs.append((w_ref, b_ref, tmask_ref, smask_ref, s_ref))
    p_ref = refs[idx]
    idx += 1
    out_ref = refs[idx]
    idx += 1
    layer_scratch = []
    for L in cfgs:
        pscr, stk = refs[idx:idx + 2]
        idx += 2
        mscr = None
        if L.pool > 1:
            mscr = refs[idx]
            idx += 1
        layer_scratch.append((pscr, stk, mscr))

    act = x_ref[...]                                      # (cin0, batch*H0*W0)

    for li, L in enumerate(cfgs):
        w_ref, b_ref, tmask_ref, smask_ref, s_ref = layer_inputs[li]
        pscr, stk, mscr = layer_scratch[li]
        n = batch * L.h * L.w
        pad = L.dil * (L.w + 1)

        # --- Conv2d(3x3, stride 1, dilation=d, padding=d) as one MXU matmul
        #     over 9 mask-shifted taps stacked along sublanes.
        pscr[...] = jnp.zeros(pscr.shape, jnp.float32)    # zero borders once
        pscr[:, pad:pad + n] = act
        for t in range(9):
            kh, kw = divmod(t, 3)
            off = ((kh - 1) * L.w + (kw - 1)) * L.dil
            sh = pscr[:, pad + off:pad + off + n]         # (cin, n) shifted window
            if kh == 1 and kw == 1:                       # center tap: mask all-ones
                stk[t * L.cin:(t + 1) * L.cin, :] = sh
            else:
                stk[t * L.cin:(t + 1) * L.cin, :] = sh * tmask_ref[t:t + 1, :]
        conv = jnp.dot(w_ref[...], stk[...],
                       preferred_element_type=jnp.float32) + b_ref[...]   # (cout, n)

        # --- MaxPool2d(kernel=stride=pool): shifted maxes + constant 0/1
        #     gather matmul for the stride-k downsample (all channels at once).
        if L.pool > 1:
            k = L.pool
            mscr[...] = jnp.zeros(mscr.shape, jnp.float32)
            mscr[:, 0:n] = conv
            m = conv
            for a in range(k):
                for c in range(k):
                    if a == 0 and c == 0:
                        continue
                    o = a * L.w + c
                    m = jnp.maximum(m, mscr[:, o:o + n])
            pooled = jnp.dot(m, s_ref[...], preferred_element_type=jnp.float32)
        else:
            pooled = conv                                  # (cout, batch*ho*wo)

        # --- ReLU
        r = jnp.maximum(pooled, 0.0)

        # --- InstanceNorm2d (affine=False, biased var, eps=1e-5), batched over
        #     channels; per-sample stats via masked lane reductions.
        inv_hw = 1.0 / float(L.ho * L.wo)
        rr = r * r
        mean_map = jnp.zeros_like(r)
        inv_map = jnp.zeros_like(r)
        for b in range(batch):
            mb = smask_ref[b:b + 1, :]                     # (1, batch*ho*wo)
            s1 = jnp.sum(r * mb, axis=1, keepdims=True) * inv_hw
            s2 = jnp.sum(rr * mb, axis=1, keepdims=True) * inv_hw
            var = jnp.maximum(s2 - s1 * s1, 0.0)
            mean_map = mean_map + s1 * mb
            inv_map = inv_map + jax.lax.rsqrt(var + eps) * mb
        act = (r - mean_map) * inv_map

    # TODO(synk): nn.Dropout treated as identity (inference semantics).

    # --- y + y.transpose(2,3) via a constant permutation matmul, then a
    #     per-sample (segmented) softmax over the flattened F*F map.
    z = act + jnp.dot(act, p_ref[...], preferred_element_type=jnp.float32)  # (1, B*F*F)
    smask_ref = layer_inputs[-1][3]
    out = jnp.zeros_like(z)
    for b in range(batch):
        mb = smask_ref[b:b + 1, :]
        zb = jnp.where(mb > 0.0, z, -1e30)
        mx = jnp.max(zb, axis=1, keepdims=True)
        e = jnp.exp(zb - mx) * mb
        s = jnp.sum(e, axis=1, keepdims=True)
        out = out + e / s
    out_ref[...] = out


# ----------------------------------------------------------------------------
# Host-side constant builders (numpy, trace-time only)
# ----------------------------------------------------------------------------
def _tap_masks(h, w, dil, batch):
    """(9, batch*h*w) validity masks for the 9 dilated conv taps."""
    ii, jj = np.meshgrid(np.arange(h), np.arange(w), indexing="ij")
    rows = []
    for kh in range(3):
        for kw in range(3):
            dh, dw = (kh - 1) * dil, (kw - 1) * dil
            ok = ((ii + dh >= 0) & (ii + dh < h) & (jj + dw >= 0) & (jj + dw < w))
            rows.append(np.tile(ok.reshape(-1), batch))
    return np.stack(rows).astype(np.float32)


def _sample_masks(hw, batch):
    """(batch, batch*hw) one-hot block masks selecting each sample's lanes."""
    m = np.zeros((batch, batch * hw), np.float32)
    for b in range(batch):
        m[b, b * hw:(b + 1) * hw] = 1.0
    return m


def _pool_select(h, w, k, batch):
    """(batch*h*w, batch*ho*wo) 0/1 gather matrix for the stride-k downsample."""
    ho, wo = h // k, w // k
    S = np.zeros((batch * h * w, batch * ho * wo), np.float32)
    for b in range(batch):
        for i in range(ho):
            for j in range(wo):
                S[b * h * w + (i * k) * w + (j * k),
                  b * ho * wo + i * wo + j] = 1.0
    return S


def _transpose_perm(f, batch):
    """(batch*f*f, batch*f*f) permutation: within-sample spatial transpose."""
    P = np.zeros((batch * f * f, batch * f * f), np.float32)
    for b in range(batch):
        for i in range(f):
            for j in range(f):
                P[b * f * f + j * f + i, b * f * f + i * f + j] = 1.0
    return P


# ----------------------------------------------------------------------------
# Wrapper
# ----------------------------------------------------------------------------
def inner_group_relation_forward(x, params):
    """x: (B, SUBSPACE_DIM, H, W) -> (B, 1, F, F).  Single fused pallas_call."""
    x = jnp.asarray(x, jnp.float32)
    B, C, H, W = map(int, x.shape)

    # Static per-layer configuration.
    cfgs = []
    cin, h, w = C, H, W
    for (wt, bs, dil, pool) in params:
        cout = int(wt.shape[0])
        assert tuple(wt.shape) == (cout, cin, 3, 3)
        ho, wo = h // pool, w // pool
        cfgs.append(LayerCfg(cin, cout, h, w, dil, pool, ho, wo))
        cin, h, w = cout, ho, wo
    assert cfgs[0].cin == C
    assert cfgs[-1].cout == 1, "last conv block must produce a single channel"
    F = cfgs[-1].ho
    assert cfgs[-1].wo == F, "non-square final map"

    # Kernel inputs: lane-dense activation + per-layer weights / masks + perm.
    inputs = [jnp.transpose(x, (1, 0, 2, 3)).reshape(C, B * H * W)]
    scratch_shapes = []
    for L, (wt, bs, _, _) in zip(cfgs, params):
        n = B * L.h * L.w
        pad = L.dil * (L.w + 1)
        inputs.append(jnp.transpose(jnp.asarray(wt, jnp.float32),
                                    (0, 2, 3, 1)).reshape(L.cout, 9 * L.cin))
        inputs.append(jnp.asarray(bs, jnp.float32).reshape(L.cout, 1))
        inputs.append(jnp.asarray(_tap_masks(L.h, L.w, L.dil, B)))
        inputs.append(jnp.asarray(_sample_masks(L.ho * L.wo, B)))
        if L.pool > 1:
            inputs.append(jnp.asarray(_pool_select(L.h, L.w, L.pool, B)))
        scratch_shapes.append(pltpu.VMEM((L.cin, n + 2 * pad), jnp.float32))
        scratch_shapes.append(pltpu.VMEM((9 * L.cin, n), jnp.float32))
        if L.pool > 1:
            scratch_shapes.append(
                pltpu.VMEM((L.cout, n + (L.pool - 1) * (L.w + 1)), jnp.float32))
    inputs.append(jnp.asarray(_transpose_perm(F, B)))

    kernel = functools.partial(_fused_kernel, cfgs=tuple(cfgs), batch=B)
    out_flat = pl.pallas_call(
        kernel,
        out_shape=jax.ShapeDtypeStruct((1, B * F * F), jnp.float32),
        in_specs=[pl.BlockSpec(memory_space=pltpu.MemorySpace.VMEM)] * len(inputs),
        out_specs=pl.BlockSpec(memory_space=pltpu.MemorySpace.VMEM),
        scratch_shapes=scratch_shapes,
    )(*inputs)
    return out_flat.reshape(B, 1, F, F)


# ----------------------------------------------------------------------------
# Parameter setup (plain-JAX glue) and pure-JAX reference
# ----------------------------------------------------------------------------
def init_params(key, subspace_dim, conv_layers_num):
    """Deterministic xavier-uniform-ish init; returns [(w, b, dilation, pool)]."""
    params = []
    cin = subspace_dim
    dil = 1

    def make_layer(key, cin, cout):
        k1, k2 = jax.random.split(key)
        bound = (6.0 / (cin * 9 + cout * 9)) ** 0.5
        w = jax.random.uniform(k1, (cout, cin, 3, 3), jnp.float32, -bound, bound)
        b = jax.random.uniform(k2, (cout,), jnp.float32, -0.1, 0.1)
        return w, b

    for _ in range(conv_layers_num - 1):
        cout = cin // 2
        key, sub = jax.random.split(key)
        w, b = make_layer(sub, cin, cout)
        params.append((w, b, dil, cout))      # MaxPool2d(kernel_size=out_channels)
        cin = cout
        dil *= 2
    key, sub = jax.random.split(key)
    w, b = make_layer(sub, cin, 1)
    params.append((w, b, dil, 1))
    return params


def _reference_forward(x, params):
    """Pure-JAX reference (no Pallas) for numerical validation."""
    h = jnp.asarray(x, jnp.float32)
    for (w, b, dil, pool) in params:
        y = jax.lax.conv_general_dilated(
            h, w, window_strides=(1, 1),
            padding=((dil, dil), (dil, dil)),
            rhs_dilation=(dil, dil),
            dimension_numbers=("NCHW", "OIHW", "NCHW"),
            precision=jax.lax.Precision.HIGHEST)
        y = y + b[None, :, None, None]
        if pool > 1:
            y = jax.lax.reduce_window(
                y, -jnp.inf, jax.lax.max,
                (1, 1, pool, pool), (1, 1, pool, pool), "VALID")
        y = jnp.maximum(y, 0.0)
        mean = jnp.mean(y, axis=(2, 3), keepdims=True)
        var = jnp.mean((y - mean) ** 2, axis=(2, 3), keepdims=True)
        h = (y - mean) * jax.lax.rsqrt(var + 1e-5)
    z = h + jnp.swapaxes(h, 2, 3)
    Bn, _, F, _ = z.shape
    sm = jax.nn.softmax(z.reshape(Bn, -1), axis=-1)
    return sm.reshape(Bn, 1, F, F)


# ----------------------------------------------------------------------------
if __name__ == "__main__":
    SUBSPACE_DIM = 4      # configs.SUBSPACE_DIM
    CONV_LAYERS_NUM = 2   # configs.CONV_LAYERS_NUM
    B, H, W = 2, 16, 16

    key = jax.random.PRNGKey(0)
    key, kx = jax.random.split(key)
    x = jax.random.normal(kx, (B, SUBSPACE_DIM, H, W), dtype=jnp.float32)
    params = init_params(key, SUBSPACE_DIM, CONV_LAYERS_NUM)

    out = inner_group_relation_forward(x, params)
    out = jax.block_until_ready(out)

    final_hw = H
    for (_, _, _, pool) in params:
        final_hw //= pool
    assert out.shape == (B, 1, final_hw, final_hw), out.shape
    assert bool(jnp.all(jnp.isfinite(out)))
    sums = jnp.sum(out.reshape(B, -1), axis=-1)
    assert bool(jnp.all(jnp.abs(sums - 1.0) < 1e-3)), sums

    ref = _reference_forward(x, params)
    err = float(jnp.max(jnp.abs(out - ref)))
    # MXU f32 matmuls may use multi-pass bf16 internally; 2e-3 is far below the
    # ~1.6e-2 magnitude of the softmax outputs, so semantic bugs still trip it.
    assert err < 2e-3, f"max abs error vs pure-JAX reference: {err}"

    print("KERNEL_OK")
</pallas_src>

<mosaic_0001>
module attributes {stable_mosaic.version = 11 : i64} {
  func.func @_fused_kernel(%arg0: memref<4x512xf32, #tpu.memory_space<vmem>>, %arg1: memref<2x36xf32, #tpu.memory_space<vmem>>, %arg2: memref<2x1xf32, #tpu.memory_space<vmem>>, %arg3: memref<9x512xf32, #tpu.memory_space<vmem>>, %arg4: memref<2x128xf32, #tpu.memory_space<vmem>>, %arg5: memref<512x128xf32, #tpu.memory_space<vmem>>, %arg6: memref<1x18xf32, #tpu.memory_space<vmem>>, %arg7: memref<1x1xf32, #tpu.memory_space<vmem>>, %arg8: memref<9x128xf32, #tpu.memory_space<vmem>>, %arg9: memref<2x128xf32, #tpu.memory_space<vmem>>, %arg10: memref<128x128xf32, #tpu.memory_space<vmem>>, %arg11: memref<1x128xf32, #tpu.memory_space<vmem>>, %arg12: memref<4x546xf32, #tpu.memory_space<vmem>>, %arg13: memref<36x512xf32, #tpu.memory_space<vmem>>, %arg14: memref<2x529xf32, #tpu.memory_space<vmem>>, %arg15: memref<2x164xf32, #tpu.memory_space<vmem>>, %arg16: memref<18x128xf32, #tpu.memory_space<vmem>>) attributes {dimension_semantics = [], scalar_prefetch = 0 : i64, scratch_operands = 5 : i64, tpu.core_type = #tpu.core_type<tc>} {
    %c0 = arith.constant 0 : index
    %c0_0 = arith.constant 0 : index
    %0 = vector.load %arg0[%c0, %c0_0] : memref<4x512xf32, #tpu.memory_space<vmem>>, vector<4x512xf32>
    %cst = arith.constant 0.000000e+00 : f32
    %1 = vector.broadcast %cst : f32 to vector<4x546xf32>
    %c0_1 = arith.constant 0 : index
    %c0_2 = arith.constant 0 : index
    %2 = vector.load %arg12[%c0_1, %c0_2] : memref<4x546xf32, #tpu.memory_space<vmem>>, vector<4x546xf32>
    tpu.vector_store %arg12[%c0_1, %c0_2], %1 {strides = array<i32>} : memref<4x546xf32, #tpu.memory_space<vmem>>, vector<4x546xf32>,
    %c0_3 = arith.constant 0 : index
    %c17 = arith.constant 17 : index
    %3 = vector.load %arg12[%c0_3, %c17] : memref<4x546xf32, #tpu.memory_space<vmem>>, vector<4x512xf32>
    tpu.vector_store %arg12[%c0_3, %c17], %0 {strides = array<i32>} : memref<4x546xf32, #tpu.memory_space<vmem>>, vector<4x512xf32>,
    %c0_4 = arith.constant 0 : index
    %c0_5 = arith.constant 0 : index
    %4 = vector.load %arg12[%c0_4, %c0_5] : memref<4x546xf32, #tpu.memory_space<vmem>>, vector<4x512xf32>
    %c0_6 = arith.constant 0 : index
    %c0_7 = arith.constant 0 : index
    %5 = vector.load %arg3[%c0_6, %c0_7] : memref<9x512xf32, #tpu.memory_space<vmem>>, vector<1x512xf32>
    %6 = vector.broadcast %5 : vector<1x512xf32> to vector<4x512xf32>
    %7 = arith.mulf %4, %6 : vector<4x512xf32>
    %c0_8 = arith.constant 0 : index
    %c0_9 = arith.constant 0 : index
    %8 = vector.load %arg13[%c0_8, %c0_9] : memref<36x512xf32, #tpu.memory_space<vmem>>, vector<4x512xf32>
    tpu.vector_store %arg13[%c0_8, %c0_9], %7 {strides = array<i32>} : memref<36x512xf32, #tpu.memory_space<vmem>>, vector<4x512xf32>,
    %c0_10 = arith.constant 0 : index
    %c1 = arith.constant 1 : index
    %9 = vector.load %arg12[%c0_10, %c1] : memref<4x546xf32, #tpu.memory_space<vmem>>, vector<4x512xf32>
    %c1_11 = arith.constant 1 : index
    %c0_12 = arith.constant 0 : index
    %10 = vector.load %arg3[%c1_11, %c0_12] : memref<9x512xf32, #tpu.memory_space<vmem>>, vector<1x512xf32>
    %11 = vector.broadcast %10 : vector<1x512xf32> to vector<4x512xf32>
    %12 = arith.mulf %9, %11 : vector<4x512xf32>
    %c4 = arith.constant 4 : index
    %c0_13 = arith.constant 0 : index
    %13 = vector.load %arg13[%c4, %c0_13] : memref<36x512xf32, #tpu.memory_space<vmem>>, vector<4x512xf32>
    tpu.vector_store %arg13[%c4, %c0_13], %12 {strides = array<i32>} : memref<36x512xf32, #tpu.memory_space<vmem>>, vector<4x512xf32>,
    %c0_14 = arith.constant 0 : index
    %c2 = arith.constant 2 : index
    %14 = vector.load %arg12[%c0_14, %c2] : memref<4x546xf32, #tpu.memory_space<vmem>>, vector<4x512xf32>
    %c2_15 = arith.constant 2 : index
    %c0_16 = arith.constant 0 : index
    %15 = vector.load %arg3[%c2_15, %c0_16] : memref<9x512xf32, #tpu.memory_space<vmem>>, vector<1x512xf32>
    %16 = vector.broadcast %15 : vector<1x512xf32> to vector<4x512xf32>
    %17 = arith.mulf %14, %16 : vector<4x512xf32>
    %c8 = arith.constant 8 : index
    %c0_17 = arith.constant 0 : index
    %18 = vector.load %arg13[%c8, %c0_17] : memref<36x512xf32, #tpu.memory_space<vmem>>, vector<4x512xf32>
    tpu.vector_store %arg13[%c8, %c0_17], %17 {strides = array<i32>} : memref<36x512xf32, #tpu.memory_space<vmem>>, vector<4x512xf32>,
    %c0_18 = arith.constant 0 : index
    %c16 = arith.constant 16 : index
    %19 = vector.load %arg12[%c0_18, %c16] : memref<4x546xf32, #tpu.memory_space<vmem>>, vector<4x512xf32>
    %c3 = arith.constant 3 : index
    %c0_19 = arith.constant 0 : index
    %20 = vector.load %arg3[%c3, %c0_19] : memref<9x512xf32, #tpu.memory_space<vmem>>, vector<1x512xf32>
    %21 = vector.broadcast %20 : vector<1x512xf32> to vector<4x512xf32>
    %22 = arith.mulf %19, %21 : vector<4x512xf32>
    %c12 = arith.constant 12 : index
    %c0_20 = arith.constant 0 : index
    %23 = vector.load %arg13[%c12, %c0_20] : memref<36x512xf32, #tpu.memory_space<vmem>>, vector<4x512xf32>
    tpu.vector_store %arg13[%c12, %c0_20], %22 {strides = array<i32>} : memref<36x512xf32, #tpu.memory_space<vmem>>, vector<4x512xf32>,
    %c0_21 = arith.constant 0 : index
    %c17_22 = arith.constant 17 : index
    %24 = vector.load %arg12[%c0_21, %c17_22] : memref<4x546xf32, #tpu.memory_space<vmem>>, vector<4x512xf32>
    %c16_23 = arith.constant 16 : index
    %c0_24 = arith.constant 0 : index
    %25 = vector.load %arg13[%c16_23, %c0_24] : memref<36x512xf32, #tpu.memory_space<vmem>>, vector<4x512xf32>
    tpu.vector_store %arg13[%c16_23, %c0_24], %24 {strides = array<i32>} : memref<36x512xf32, #tpu.memory_space<vmem>>, vector<4x512xf32>,
    %c0_25 = arith.constant 0 : index
    %c18 = arith.constant 18 : index
    %26 = vector.load %arg12[%c0_25, %c18] : memref<4x546xf32, #tpu.memory_space<vmem>>, vector<4x512xf32>
    %c5 = arith.constant 5 : index
    %c0_26 = arith.constant 0 : index
    %27 = vector.load %arg3[%c5, %c0_26] : memref<9x512xf32, #tpu.memory_space<vmem>>, vector<1x512xf32>
    %28 = vector.broadcast %27 : vector<1x512xf32> to vector<4x512xf32>
    %29 = arith.mulf %26, %28 : vector<4x512xf32>
    %c20 = arith.constant 20 : index
    %c0_27 = arith.constant 0 : index
    %30 = vector.load %arg13[%c20, %c0_27] : memref<36x512xf32, #tpu.memory_space<vmem>>, vector<4x512xf32>
    tpu.vector_store %arg13[%c20, %c0_27], %29 {strides = array<i32>} : memref<36x512xf32, #tpu.memory_space<vmem>>, vector<4x512xf32>,
    %c0_28 = arith.constant 0 : index
    %c32 = arith.constant 32 : index
    %31 = vector.load %arg12[%c0_28, %c32] : memref<4x546xf32, #tpu.memory_space<vmem>>, vector<4x512xf32>
    %c6 = arith.constant 6 : index
    %c0_29 = arith.constant 0 : index
    %32 = vector.load %arg3[%c6, %c0_29] : memref<9x512xf32, #tpu.memory_space<vmem>>, vector<1x512xf32>
    %33 = vector.broadcast %32 : vector<1x512xf32> to vector<4x512xf32>
    %34 = arith.mulf %31, %33 : vector<4x512xf32>
    %c24 = arith.constant 24 : index
    %c0_30 = arith.constant 0 : index
    %35 = vector.load %arg13[%c24, %c0_30] : memref<36x512xf32, #tpu.memory_space<vmem>>, vector<4x512xf32>
    tpu.vector_store %arg13[%c24, %c0_30], %34 {strides = array<i32>} : memref<36x512xf32, #tpu.memory_space<vmem>>, vector<4x512xf32>,
    %c0_31 = arith.constant 0 : index
    %c33 = arith.constant 33 : index
    %36 = vector.load %arg12[%c0_31, %c33] : memref<4x546xf32, #tpu.memory_space<vmem>>, vector<4x512xf32>
    %c7 = arith.constant 7 : index
    %c0_32 = arith.constant 0 : index
    %37 = vector.load %arg3[%c7, %c0_32] : memref<9x512xf32, #tpu.memory_space<vmem>>, vector<1x512xf32>
    %38 = vector.broadcast %37 : vector<1x512xf32> to vector<4x512xf32>
    %39 = arith.mulf %36, %38 : vector<4x512xf32>
    %c28 = arith.constant 28 : index
    %c0_33 = arith.constant 0 : index
    %40 = vector.load %arg13[%c28, %c0_33] : memref<36x512xf32, #tpu.memory_space<vmem>>, vector<4x512xf32>
    tpu.vector_store %arg13[%c28, %c0_33], %39 {strides = array<i32>} : memref<36x512xf32, #tpu.memory_space<vmem>>, vector<4x512xf32>,
    %c0_34 = arith.constant 0 : index
    %c34 = arith.constant 34 : index
    %41 = vector.load %arg12[%c0_34, %c34] : memref<4x546xf32, #tpu.memory_space<vmem>>, vector<4x512xf32>
    %c8_35 = arith.constant 8 : index
    %c0_36 = arith.constant 0 : index
    %42 = vector.load %arg3[%c8_35, %c0_36] : memref<9x512xf32, #tpu.memory_space<vmem>>, vector<1x512xf32>
    %43 = vector.broadcast %42 : vector<1x512xf32> to vector<4x512xf32>
    %44 = arith.mulf %41, %43 : vector<4x512xf32>
    %c32_37 = arith.constant 32 : index
    %c0_38 = arith.constant 0 : index
    %45 = vector.load %arg13[%c32_37, %c0_38] : memref<36x512xf32, #tpu.memory_space<vmem>>, vector<4x512xf32>
    tpu.vector_store %arg13[%c32_37, %c0_38], %44 {strides = array<i32>} : memref<36x512xf32, #tpu.memory_space<vmem>>, vector<4x512xf32>,
    %c0_39 = arith.constant 0 : index
    %c0_40 = arith.constant 0 : index
    %46 = vector.load %arg1[%c0_39, %c0_40] : memref<2x36xf32, #tpu.memory_space<vmem>>, vector<2x36xf32>
    %c0_41 = arith.constant 0 : index
    %c0_42 = arith.constant 0 : index
    %47 = vector.load %arg13[%c0_41, %c0_42] : memref<36x512xf32, #tpu.memory_space<vmem>>, vector<36x512xf32>
    %cst_43 = arith.constant dense<0.000000e+00> : vector<2x512xf32>
    %48 = tpu.matmul %46, %47, %cst_43 {dimension_numbers = #tpu.dot_dimension_numbers<[1], [0], [0], [1], [0, 0, 1, 1], [], []>} : vector<2x36xf32>, vector<36x512xf32>, vector<2x512xf32> -> vector<2x512xf32>
    %c0_44 = arith.constant 0 : index
    %c0_45 = arith.constant 0 : index
    %49 = vector.load %arg2[%c0_44, %c0_45] : memref<2x1xf32, #tpu.memory_space<vmem>>, vector<2x1xf32>
    %50 = vector.broadcast %49 : vector<2x1xf32> to vector<2x512xf32>
    %51 = arith.addf %48, %50 : vector<2x512xf32>
    %cst_46 = arith.constant 0.000000e+00 : f32
    %52 = vector.broadcast %cst_46 : f32 to vector<2x529xf32>
    %c0_47 = arith.constant 0 : index
    %c0_48 = arith.constant 0 : index
    %53 = vector.load %arg14[%c0_47, %c0_48] : memref<2x529xf32, #tpu.memory_space<vmem>>, vector<2x529xf32>
    tpu.vector_store %arg14[%c0_47, %c0_48], %52 {strides = array<i32>} : memref<2x529xf32, #tpu.memory_space<vmem>>, vector<2x529xf32>,
    %c0_49 = arith.constant 0 : index
    %c0_50 = arith.constant 0 : index
    %54 = vector.load %arg14[%c0_49, %c0_50] : memref<2x529xf32, #tpu.memory_space<vmem>>, vector<2x512xf32>
    tpu.vector_store %arg14[%c0_49, %c0_50], %51 {strides = array<i32>} : memref<2x529xf32, #tpu.memory_space<vmem>>, vector<2x512xf32>,
    %c0_51 = arith.constant 0 : index
    %c1_52 = arith.constant 1 : index
    %55 = vector.load %arg14[%c0_51, %c1_52] : memref<2x529xf32, #tpu.memory_space<vmem>>, vector<2x512xf32>
    %56 = arith.maximumf %51, %55 : vector<2x512xf32>
    %c0_53 = arith.constant 0 : index
    %c16_54 = arith.constant 16 : index
    %57 = vector.load %arg14[%c0_53, %c16_54] : memref<2x529xf32, #tpu.memory_space<vmem>>, vector<2x512xf32>
    %58 = arith.maximumf %56, %57 : vector<2x512xf32>
    %c0_55 = arith.constant 0 : index
    %c17_56 = arith.constant 17 : index
    %59 = vector.load %arg14[%c0_55, %c17_56] : memref<2x529xf32, #tpu.memory_space<vmem>>, vector<2x512xf32>
    %60 = arith.maximumf %58, %59 : vector<2x512xf32>
    %c0_57 = arith.constant 0 : index
    %c0_58 = arith.constant 0 : index
    %61 = vector.load %arg5[%c0_57, %c0_58] : memref<512x128xf32, #tpu.memory_space<vmem>>, vector<512x128xf32>
    %cst_59 = arith.constant dense<0.000000e+00> : vector<2x128xf32>
    %62 = tpu.matmul %60, %61, %cst_59 {dimension_numbers = #tpu.dot_dimension_numbers<[1], [0], [0], [1], [0, 0, 1, 1], [], []>} : vector<2x512xf32>, vector<512x128xf32>, vector<2x128xf32> -> vector<2x128xf32>
    %cst_60 = arith.constant 0.000000e+00 : f32
    %63 = vector.broadcast %cst_60 : f32 to vector<2x128xf32>
    %64 = arith.maximumf %62, %63 : vector<2x128xf32>
    %65 = arith.mulf %64, %64 : vector<2x128xf32>
    %cst_61 = arith.constant 0.000000e+00 : f32
    %66 = vector.broadcast %cst_61 : f32 to vector<2x128xf32>
    %cst_62 = arith.constant 0.000000e+00 : f32
    %67 = vector.broadcast %cst_62 : f32 to vector<2x128xf32>
    %c0_63 = arith.constant 0 : index
    %c0_64 = arith.constant 0 : index
    %68 = vector.load %arg4[%c0_63, %c0_64] : memref<2x128xf32, #tpu.memory_space<vmem>>, vector<1x128xf32>
    %69 = vector.broadcast %68 : vector<1x128xf32> to vector<2x128xf32>
    %70 = arith.mulf %64, %69 : vector<2x128xf32>
    %cst_65 = arith.constant dense<0.000000e+00> : vector<2xf32>
    %71 = vector.multi_reduction <add>, %70, %cst_65 [1] : vector<2x128xf32> to vector<2xf32>
    %72 = vector.shape_cast %71 : vector<2xf32> to vector<2x1xf32>
    %cst_66 = arith.constant 1.562500e-02 : f32
    %73 = vector.broadcast %cst_66 : f32 to vector<2x1xf32>
    %74 = arith.mulf %72, %73 : vector<2x1xf32>
    %75 = vector.broadcast %68 : vector<1x128xf32> to vector<2x128xf32>
    %76 = arith.mulf %65, %75 : vector<2x128xf32>
    %cst_67 = arith.constant dense<0.000000e+00> : vector<2xf32>
    %77 = vector.multi_reduction <add>, %76, %cst_67 [1] : vector<2x128xf32> to vector<2xf32>
    %78 = vector.shape_cast %77 : vector<2xf32> to vector<2x1xf32>
    %cst_68 = arith.constant 1.562500e-02 : f32
    %79 = vector.broadcast %cst_68 : f32 to vector<2x1xf32>
    %80 = arith.mulf %78, %79 : vector<2x1xf32>
    %81 = arith.mulf %74, %74 : vector<2x1xf32>
    %82 = arith.subf %80, %81 : vector<2x1xf32>
    %cst_69 = arith.constant 0.000000e+00 : f32
    %83 = vector.broadcast %cst_69 : f32 to vector<2x1xf32>
    %84 = arith.maximumf %82, %83 : vector<2x1xf32>
    %85 = vector.broadcast %74 : vector<2x1xf32> to vector<2x128xf32>
    %86 = vector.broadcast %68 : vector<1x128xf32> to vector<2x128xf32>
    %87 = arith.mulf %85, %86 : vector<2x128xf32>
    %88 = arith.addf %66, %87 : vector<2x128xf32>
    %cst_70 = arith.constant 9.99999974E-6 : f32
    %89 = vector.broadcast %cst_70 : f32 to vector<2x1xf32>
    %90 = arith.addf %84, %89 : vector<2x1xf32>
    %91 = math.rsqrt %90 : vector<2x1xf32>
    %92 = vector.broadcast %91 : vector<2x1xf32> to vector<2x128xf32>
    %93 = vector.broadcast %68 : vector<1x128xf32> to vector<2x128xf32>
    %94 = arith.mulf %92, %93 : vector<2x128xf32>
    %95 = arith.addf %67, %94 : vector<2x128xf32>
    %c1_71 = arith.constant 1 : index
    %c0_72 = arith.constant 0 : index
    %96 = vector.load %arg4[%c1_71, %c0_72] : memref<2x128xf32, #tpu.memory_space<vmem>>, vector<1x128xf32>
    %97 = vector.broadcast %96 : vector<1x128xf32> to vector<2x128xf32>
    %98 = arith.mulf %64, %97 : vector<2x128xf32>
    %cst_73 = arith.constant dense<0.000000e+00> : vector<2xf32>
    %99 = vector.multi_reduction <add>, %98, %cst_73 [1] : vector<2x128xf32> to vector<2xf32>
    %100 = vector.shape_cast %99 : vector<2xf32> to vector<2x1xf32>
    %cst_74 = arith.constant 1.562500e-02 : f32
    %101 = vector.broadcast %cst_74 : f32 to vector<2x1xf32>
    %102 = arith.mulf %100, %101 : vector<2x1xf32>
    %103 = vector.broadcast %96 : vector<1x128xf32> to vector<2x128xf32>
    %104 = arith.mulf %65, %103 : vector<2x128xf32>
    %cst_75 = arith.constant dense<0.000000e+00> : vector<2xf32>
    %105 = vector.multi_reduction <add>, %104, %cst_75 [1] : vector<2x128xf32> to vector<2xf32>
    %106 = vector.shape_cast %105 : vector<2xf32> to vector<2x1xf32>
    %cst_76 = arith.constant 1.562500e-02 : f32
    %107 = vector.broadcast %cst_76 : f32 to vector<2x1xf32>
    %108 = arith.mulf %106, %107 : vector<2x1xf32>
    %109 = arith.mulf %102, %102 : vector<2x1xf32>
    %110 = arith.subf %108, %109 : vector<2x1xf32>
    %cst_77 = arith.constant 0.000000e+00 : f32
    %111 = vector.broadcast %cst_77 : f32 to vector<2x1xf32>
    %112 = arith.maximumf %110, %111 : vector<2x1xf32>
    %113 = vector.broadcast %102 : vector<2x1xf32> to vector<2x128xf32>
    %114 = vector.broadcast %96 : vector<1x128xf32> to vector<2x128xf32>
    %115 = arith.mulf %113, %114 : vector<2x128xf32>
    %116 = arith.addf %88, %115 : vector<2x128xf32>
    %cst_78 = arith.constant 9.99999974E-6 : f32
    %117 = vector.broadcast %cst_78 : f32 to vector<2x1xf32>
    %118 = arith.addf %112, %117 : vector<2x1xf32>
    %119 = math.rsqrt %118 : vector<2x1xf32>
    %120 = vector.broadcast %119 : vector<2x1xf32> to vector<2x128xf32>
    %121 = vector.broadcast %96 : vector<1x128xf32> to vector<2x128xf32>
    %122 = arith.mulf %120, %121 : vector<2x128xf32>
    %123 = arith.addf %95, %122 : vector<2x128xf32>
    %124 = arith.subf %64, %116 : vector<2x128xf32>
    %125 = arith.mulf %124, %123 : vector<2x128xf32>
    %cst_79 = arith.constant 0.000000e+00 : f32
    %126 = vector.broadcast %cst_79 : f32 to vector<2x164xf32>
    %c0_80 = arith.constant 0 : index
    %c0_81 = arith.constant 0 : index
    %127 = vector.load %arg15[%c0_80, %c0_81] : memref<2x164xf32, #tpu.memory_space<vmem>>, vector<2x164xf32>
    tpu.vector_store %arg15[%c0_80, %c0_81], %126 {strides = array<i32>} : memref<2x164xf32, #tpu.memory_space<vmem>>, vector<2x164xf32>,
    %c0_82 = arith.constant 0 : index
    %c18_83 = arith.constant 18 : index
    %128 = vector.load %arg15[%c0_82, %c18_83] : memref<2x164xf32, #tpu.memory_space<vmem>>, vector<2x128xf32>
    tpu.vector_store %arg15[%c0_82, %c18_83], %125 {strides = array<i32>} : memref<2x164xf32, #tpu.memory_space<vmem>>, vector<2x128xf32>,
    %c0_84 = arith.constant 0 : index
    %c0_85 = arith.constant 0 : index
    %129 = vector.load %arg15[%c0_84, %c0_85] : memref<2x164xf32, #tpu.memory_space<vmem>>, vector<2x128xf32>
    %c0_86 = arith.constant 0 : index
    %c0_87 = arith.constant 0 : index
    %130 = vector.load %arg8[%c0_86, %c0_87] : memref<9x128xf32, #tpu.memory_space<vmem>>, vector<1x128xf32>
    %131 = vector.broadcast %130 : vector<1x128xf32> to vector<2x128xf32>
    %132 = arith.mulf %129, %131 : vector<2x128xf32>
    %c0_88 = arith.constant 0 : index
    %c0_89 = arith.constant 0 : index
    %133 = vector.load %arg16[%c0_88, %c0_89] : memref<18x128xf32, #tpu.memory_space<vmem>>, vector<2x128xf32>
    tpu.vector_store %arg16[%c0_88, %c0_89], %132 {strides = array<i32>} : memref<18x128xf32, #tpu.memory_space<vmem>>, vector<2x128xf32>,
    %c0_90 = arith.constant 0 : index
    %c2_91 = arith.constant 2 : index
    %134 = vector.load %arg15[%c0_90, %c2_91] : memref<2x164xf32, #tpu.memory_space<vmem>>, vector<2x128xf32>
    %c1_92 = arith.constant 1 : index
    %c0_93 = arith.constant 0 : index
    %135 = vector.load %arg8[%c1_92, %c0_93] : memref<9x128xf32, #tpu.memory_space<vmem>>, vector<1x128xf32>
    %136 = vector.broadcast %135 : vector<1x128xf32> to vector<2x128xf32>
    %137 = arith.mulf %134, %136 : vector<2x128xf32>
    %c2_94 = arith.constant 2 : index
    %c0_95 = arith.constant 0 : index
    %138 = vector.load %arg16[%c2_94, %c0_95] : memref<18x128xf32, #tpu.memory_space<vmem>>, vector<2x128xf32>
    tpu.vector_store %arg16[%c2_94, %c0_95], %137 {strides = array<i32>} : memref<18x128xf32, #tpu.memory_space<vmem>>, vector<2x128xf32>,
    %c0_96 = arith.constant 0 : index
    %c4_97 = arith.constant 4 : index
    %139 = vector.load %arg15[%c0_96, %c4_97] : memref<2x164xf32, #tpu.memory_space<vmem>>, vector<2x128xf32>
    %c2_98 = arith.constant 2 : index
    %c0_99 = arith.constant 0 : index
    %140 = vector.load %arg8[%c2_98, %c0_99] : memref<9x128xf32, #tpu.memory_space<vmem>>, vector<1x128xf32>
    %141 = vector.broadcast %140 : vector<1x128xf32> to vector<2x128xf32>
    %142 = arith.mulf %139, %141 : vector<2x128xf32>
    %c4_100 = arith.constant 4 : index
    %c0_101 = arith.constant 0 : index
    %143 = vector.load %arg16[%c4_100, %c0_101] : memref<18x128xf32, #tpu.memory_space<vmem>>, vector<2x128xf32>
    tpu.vector_store %arg16[%c4_100, %c0_101], %142 {strides = array<i32>} : memref<18x128xf32, #tpu.memory_space<vmem>>, vector<2x128xf32>,
    %c0_102 = arith.constant 0 : index
    %c16_103 = arith.constant 16 : index
    %144 = vector.load %arg15[%c0_102, %c16_103] : memref<2x164xf32, #tpu.memory_space<vmem>>, vector<2x128xf32>
    %c3_104 = arith.constant 3 : index
    %c0_105 = arith.constant 0 : index
    %145 = vector.load %arg8[%c3_104, %c0_105] : memref<9x128xf32, #tpu.memory_space<vmem>>, vector<1x128xf32>
    %146 = vector.broadcast %145 : vector<1x128xf32> to vector<2x128xf32>
    %147 = arith.mulf %144, %146 : vector<2x128xf32>
    %c6_106 = arith.constant 6 : index
    %c0_107 = arith.constant 0 : index
    %148 = vector.load %arg16[%c6_106, %c0_107] : memref<18x128xf32, #tpu.memory_space<vmem>>, vector<2x128xf32>
    tpu.vector_store %arg16[%c6_106, %c0_107], %147 {strides = array<i32>} : memref<18x128xf32, #tpu.memory_space<vmem>>, vector<2x128xf32>,
    %c0_108 = arith.constant 0 : index
    %c18_109 = arith.constant 18 : index
    %149 = vector.load %arg15[%c0_108, %c18_109] : memref<2x164xf32, #tpu.memory_space<vmem>>, vector<2x128xf32>
    %c8_110 = arith.constant 8 : index
    %c0_111 = arith.constant 0 : index
    %150 = vector.load %arg16[%c8_110, %c0_111] : memref<18x128xf32, #tpu.memory_space<vmem>>, vector<2x128xf32>
    tpu.vector_store %arg16[%c8_110, %c0_111], %149 {strides = array<i32>} : memref<18x128xf32, #tpu.memory_space<vmem>>, vector<2x128xf32>,
    %c0_112 = arith.constant 0 : index
    %c20_113 = arith.constant 20 : index
    %151 = vector.load %arg15[%c0_112, %c20_113] : memref<2x164xf32, #tpu.memory_space<vmem>>, vector<2x128xf32>
    %c5_114 = arith.constant 5 : index
    %c0_115 = arith.constant 0 : index
    %152 = vector.load %arg8[%c5_114, %c0_115] : memref<9x128xf32, #tpu.memory_space<vmem>>, vector<1x128xf32>
    %153 = vector.broadcast %152 : vector<1x128xf32> to vector<2x128xf32>
    %154 = arith.mulf %151, %153 : vector<2x128xf32>
    %c10 = arith.constant 10 : index
    %c0_116 = arith.constant 0 : index
    %155 = vector.load %arg16[%c10, %c0_116] : memref<18x128xf32, #tpu.memory_space<vmem>>, vector<2x128xf32>
    tpu.vector_store %arg16[%c10, %c0_116], %154 {strides = array<i32>} : memref<18x128xf32, #tpu.memory_space<vmem>>, vector<2x128xf32>,
    %c0_117 = arith.constant 0 : index
    %c32_118 = arith.constant 32 : index
    %156 = vector.load %arg15[%c0_117, %c32_118] : memref<2x164xf32, #tpu.memory_space<vmem>>, vector<2x128xf32>
    %c6_119 = arith.constant 6 : index
    %c0_120 = arith.constant 0 : index
    %157 = vector.load %arg8[%c6_119, %c0_120] : memref<9x128xf32, #tpu.memory_space<vmem>>, vector<1x128xf32>
    %158 = vector.broadcast %157 : vector<1x128xf32> to vector<2x128xf32>
    %159 = arith.mulf %156, %158 : vector<2x128xf32>
    %c12_121 = arith.constant 12 : index
    %c0_122 = arith.constant 0 : index
    %160 = vector.load %arg16[%c12_121, %c0_122] : memref<18x128xf32, #tpu.memory_space<vmem>>, vector<2x128xf32>
    tpu.vector_store %arg16[%c12_121, %c0_122], %159 {strides = array<i32>} : memref<18x128xf32, #tpu.memory_space<vmem>>, vector<2x128xf32>,
    %c0_123 = arith.constant 0 : index
    %c34_124 = arith.constant 34 : index
    %161 = vector.load %arg15[%c0_123, %c34_124] : memref<2x164xf32, #tpu.memory_space<vmem>>, vector<2x128xf32>
    %c7_125 = arith.constant 7 : index
    %c0_126 = arith.constant 0 : index
    %162 = vector.load %arg8[%c7_125, %c0_126] : memref<9x128xf32, #tpu.memory_space<vmem>>, vector<1x128xf32>
    %163 = vector.broadcast %162 : vector<1x128xf32> to vector<2x128xf32>
    %164 = arith.mulf %161, %163 : vector<2x128xf32>
    %c14 = arith.constant 14 : index
    %c0_127 = arith.constant 0 : index
    %165 = vector.load %arg16[%c14, %c0_127] : memref<18x128xf32, #tpu.memory_space<vmem>>, vector<2x128xf32>
    tpu.vector_store %arg16[%c14, %c0_127], %164 {strides = array<i32>} : memref<18x128xf32, #tpu.memory_space<vmem>>, vector<2x128xf32>,
    %c0_128 = arith.constant 0 : index
    %c36 = arith.constant 36 : index
    %166 = vector.load %arg15[%c0_128, %c36] : memref<2x164xf32, #tpu.memory_space<vmem>>, vector<2x128xf32>
    %c8_129 = arith.constant 8 : index
    %c0_130 = arith.constant 0 : index
    %167 = vector.load %arg8[%c8_129, %c0_130] : memref<9x128xf32, #tpu.memory_space<vmem>>, vector<1x128xf32>
    %168 = vector.broadcast %167 : vector<1x128xf32> to vector<2x128xf32>
    %169 = arith.mulf %166, %168 : vector<2x128xf32>
    %c16_131 = arith.constant 16 : index
    %c0_132 = arith.constant 0 : index
    %170 = vector.load %arg16[%c16_131, %c0_132] : memref<18x128xf32, #tpu.memory_space<vmem>>, vector<2x128xf32>
    tpu.vector_store %arg16[%c16_131, %c0_132], %169 {strides = array<i32>} : memref<18x128xf32, #tpu.memory_space<vmem>>, vector<2x128xf32>,
    %c0_133 = arith.constant 0 : index
    %c0_134 = arith.constant 0 : index
    %171 = vector.load %arg6[%c0_133, %c0_134] : memref<1x18xf32, #tpu.memory_space<vmem>>, vector<1x18xf32>
    %c0_135 = arith.constant 0 : index
    %c0_136 = arith.constant 0 : index
    %172 = vector.load %arg16[%c0_135, %c0_136] : memref<18x128xf32, #tpu.memory_space<vmem>>, vector<18x128xf32>
    %cst_137 = arith.constant dense<0.000000e+00> : vector<1x128xf32>
    %173 = tpu.matmul %171, %172, %cst_137 {dimension_numbers = #tpu.dot_dimension_numbers<[1], [0], [0], [1], [0, 0, 1, 1], [], []>} : vector<1x18xf32>, vector<18x128xf32>, vector<1x128xf32> -> vector<1x128xf32>
    %c0_138 = arith.constant 0 : index
    %c0_139 = arith.constant 0 : index
    %174 = vector.load %arg7[%c0_138, %c0_139] : memref<1x1xf32, #tpu.memory_space<vmem>>, vector<1x1xf32>
    %175 = vector.broadcast %174 : vector<1x1xf32> to vector<1x128xf32>
    %176 = arith.addf %173, %175 : vector<1x128xf32>
    %cst_140 = arith.constant 0.000000e+00 : f32
    %177 = vector.broadcast %cst_140 : f32 to vector<1x128xf32>
    %178 = arith.maximumf %176, %177 : vector<1x128xf32>
    %179 = arith.mulf %178, %178 : vector<1x128xf32>
    %cst_141 = arith.constant 0.000000e+00 : f32
    %180 = vector.broadcast %cst_141 : f32 to vector<1x128xf32>
    %cst_142 = arith.constant 0.000000e+00 : f32
    %181 = vector.broadcast %cst_142 : f32 to vector<1x128xf32>
    %c0_143 = arith.constant 0 : index
    %c0_144 = arith.constant 0 : index
    %182 = vector.load %arg9[%c0_143, %c0_144] : memref<2x128xf32, #tpu.memory_space<vmem>>, vector<1x128xf32>
    %183 = arith.mulf %178, %182 : vector<1x128xf32>
    %cst_145 = arith.constant dense<0.000000e+00> : vector<1xf32>
    %184 = vector.multi_reduction <add>, %183, %cst_145 [1] : vector<1x128xf32> to vector<1xf32>
    %185 = vector.shape_cast %184 : vector<1xf32> to vector<1x1xf32>
    %cst_146 = arith.constant 1.562500e-02 : f32
    %186 = vector.broadcast %cst_146 : f32 to vector<1x1xf32>
    %187 = arith.mulf %185, %186 : vector<1x1xf32>
    %188 = arith.mulf %179, %182 : vector<1x128xf32>
    %cst_147 = arith.constant dense<0.000000e+00> : vector<1xf32>
    %189 = vector.multi_reduction <add>, %188, %cst_147 [1] : vector<1x128xf32> to vector<1xf32>
    %190 = vector.shape_cast %189 : vector<1xf32> to vector<1x1xf32>
    %cst_148 = arith.constant 1.562500e-02 : f32
    %191 = vector.broadcast %cst_148 : f32 to vector<1x1xf32>
    %192 = arith.mulf %190, %191 : vector<1x1xf32>
    %193 = arith.mulf %187, %187 : vector<1x1xf32>
    %194 = arith.subf %192, %193 : vector<1x1xf32>
    %cst_149 = arith.constant 0.000000e+00 : f32
    %195 = vector.broadcast %cst_149 : f32 to vector<1x1xf32>
    %196 = arith.maximumf %194, %195 : vector<1x1xf32>
    %197 = vector.broadcast %187 : vector<1x1xf32> to vector<1x128xf32>
    %198 = arith.mulf %197, %182 : vector<1x128xf32>
    %199 = arith.addf %180, %198 : vector<1x128xf32>
    %cst_150 = arith.constant 9.99999974E-6 : f32
    %200 = vector.broadcast %cst_150 : f32 to vector<1x1xf32>
    %201 = arith.addf %196, %200 : vector<1x1xf32>
    %202 = math.rsqrt %201 : vector<1x1xf32>
    %203 = vector.broadcast %202 : vector<1x1xf32> to vector<1x128xf32>
    %204 = arith.mulf %203, %182 : vector<1x128xf32>
    %205 = arith.addf %181, %204 : vector<1x128xf32>
    %c1_151 = arith.constant 1 : index
    %c0_152 = arith.constant 0 : index
    %206 = vector.load %arg9[%c1_151, %c0_152] : memref<2x128xf32, #tpu.memory_space<vmem>>, vector<1x128xf32>
    %207 = arith.mulf %178, %206 : vector<1x128xf32>
    %cst_153 = arith.constant dense<0.000000e+00> : vector<1xf32>
    %208 = vector.multi_reduction <add>, %207, %cst_153 [1] : vector<1x128xf32> to vector<1xf32>
    %209 = vector.shape_cast %208 : vector<1xf32> to vector<1x1xf32>
    %cst_154 = arith.constant 1.562500e-02 : f32
    %210 = vector.broadcast %cst_154 : f32 to vector<1x1xf32>
    %211 = arith.mulf %209, %210 : vector<1x1xf32>
    %212 = arith.mulf %179, %206 : vector<1x128xf32>
    %cst_155 = arith.constant dense<0.000000e+00> : vector<1xf32>
    %213 = vector.multi_reduction <add>, %212, %cst_155 [1] : vector<1x128xf32> to vector<1xf32>
    %214 = vector.shape_cast %213 : vector<1xf32> to vector<1x1xf32>
    %cst_156 = arith.constant 1.562500e-02 : f32
    %215 = vector.broadcast %cst_156 : f32 to vector<1x1xf32>
    %216 = arith.mulf %214, %215 : vector<1x1xf32>
    %217 = arith.mulf %211, %211 : vector<1x1xf32>
    %218 = arith.subf %216, %217 : vector<1x1xf32>
    %cst_157 = arith.constant 0.000000e+00 : f32
    %219 = vector.broadcast %cst_157 : f32 to vector<1x1xf32>
    %220 = arith.maximumf %218, %219 : vector<1x1xf32>
    %221 = vector.broadcast %211 : vector<1x1xf32> to vector<1x128xf32>
    %222 = arith.mulf %221, %206 : vector<1x128xf32>
    %223 = arith.addf %199, %222 : vector<1x128xf32>
    %cst_158 = arith.constant 9.99999974E-6 : f32
    %224 = vector.broadcast %cst_158 : f32 to vector<1x1xf32>
    %225 = arith.addf %220, %224 : vector<1x1xf32>
    %226 = math.rsqrt %225 : vector<1x1xf32>
    %227 = vector.broadcast %226 : vector<1x1xf32> to vector<1x128xf32>
    %228 = arith.mulf %227, %206 : vector<1x128xf32>
    %229 = arith.addf %205, %228 : vector<1x128xf32>
    %230 = arith.subf %178, %223 : vector<1x128xf32>
    %231 = arith.mulf %230, %229 : vector<1x128xf32>
    %c0_159 = arith.constant 0 : index
    %c0_160 = arith.constant 0 : index
    %232 = vector.load %arg10[%c0_159, %c0_160] : memref<128x128xf32, #tpu.memory_space<vmem>>, vector<128x128xf32>
    %cst_161 = arith.constant dense<0.000000e+00> : vector<1x128xf32>
    %233 = tpu.matmul %231, %232, %cst_161 {dimension_numbers = #tpu.dot_dimension_numbers<[1], [0], [0], [1], [0, 0, 1, 1], [], []>} : vector<1x128xf32>, vector<128x128xf32>, vector<1x128xf32> -> vector<1x128xf32>
    %234 = arith.addf %231, %233 : vector<1x128xf32>
    %cst_162 = arith.constant 0.000000e+00 : f32
    %235 = vector.broadcast %cst_162 : f32 to vector<1x128xf32>
    %c0_163 = arith.constant 0 : index
    %c0_164 = arith.constant 0 : index
    %236 = vector.load %arg9[%c0_163, %c0_164] : memref<2x128xf32, #tpu.memory_space<vmem>>, vector<1x128xf32>
    %cst_165 = arith.constant 0.000000e+00 : f32
    %237 = vector.broadcast %cst_165 : f32 to vector<1x128xf32>
    %238 = arith.cmpf ogt, %236, %237 : vector<1x128xf32>
    %cst_166 = arith.constant -1.000000e+30 : f32
    %239 = vector.broadcast %cst_166 : f32 to vector<1x128xf32>
    %240 = arith.select %238, %234, %239 : vector<1x128xi1>, vector<1x128xf32>
    %cst_167 = arith.constant dense<0xFF800000> : vector<1xf32>
    %241 = vector.multi_reduction <maximumf>, %240, %cst_167 [1] : vector<1x128xf32> to vector<1xf32>
    %242 = vector.shape_cast %241 : vector<1xf32> to vector<1x1xf32>
    %243 = vector.broadcast %242 : vector<1x1xf32> to vector<1x128xf32>
    %244 = arith.subf %240, %243 : vector<1x128xf32>
    %245 = math.exp %244 : vector<1x128xf32>
    %246 = arith.mulf %245, %236 : vector<1x128xf32>
    %cst_168 = arith.constant dense<0.000000e+00> : vector<1xf32>
    %247 = vector.multi_reduction <add>, %246, %cst_168 [1] : vector<1x128xf32> to vector<1xf32>
    %248 = vector.shape_cast %247 : vector<1xf32> to vector<1x1xf32>
    %249 = vector.broadcast %248 : vector<1x1xf32> to vector<1x128xf32>
    %250 = arith.divf %246, %249 : vector<1x128xf32>
    %251 = arith.addf %235, %250 : vector<1x128xf32>
    %c1_169 = arith.constant 1 : index
    %c0_170 = arith.constant 0 : index
    %252 = vector.load %arg9[%c1_169, %c0_170] : memref<2x128xf32, #tpu.memory_space<vmem>>, vector<1x128xf32>
    %cst_171 = arith.constant 0.000000e+00 : f32
    %253 = vector.broadcast %cst_171 : f32 to vector<1x128xf32>
    %254 = arith.cmpf ogt, %252, %253 : vector<1x128xf32>
    %cst_172 = arith.constant -1.000000e+30 : f32
    %255 = vector.broadcast %cst_172 : f32 to vector<1x128xf32>
    %256 = arith.select %254, %234, %255 : vector<1x128xi1>, vector<1x128xf32>
    %cst_173 = arith.constant dense<0xFF800000> : vector<1xf32>
    %257 = vector.multi_reduction <maximumf>, %256, %cst_173 [1] : vector<1x128xf32> to vector<1xf32>
    %258 = vector.shape_cast %257 : vector<1xf32> to vector<1x1xf32>
    %259 = vector.broadcast %258 : vector<1x1xf32> to vector<1x128xf32>
    %260 = arith.subf %256, %259 : vector<1x128xf32>
    %261 = math.exp %260 : vector<1x128xf32>
    %262 = arith.mulf %261, %252 : vector<1x128xf32>
    %cst_174 = arith.constant dense<0.000000e+00> : vector<1xf32>
    %263 = vector.multi_reduction <add>, %262, %cst_174 [1] : vector<1x128xf32> to vector<1xf32>
    %264 = vector.shape_cast %263 : vector<1xf32> to vector<1x1xf32>
    %265 = vector.broadcast %264 : vector<1x1xf32> to vector<1x128xf32>
    %266 = arith.divf %262, %265 : vector<1x128xf32>
    %267 = arith.addf %251, %266 : vector<1x128xf32>
    %c0_175 = arith.constant 0 : index
    %c0_176 = arith.constant 0 : index
    %268 = vector.load %arg11[%c0_175, %c0_176] : memref<1x128xf32, #tpu.memory_space<vmem>>, vector<1x128xf32>
    tpu.vector_store %arg11[%c0_175, %c0_176], %267 {strides = array<i32>} : memref<1x128xf32, #tpu.memory_space<vmem>>, vector<1x128xf32>,
    return
  }
}

</mosaic_0001>

<bundles_post_ra>
// kernel: tpu_custom_call.1
= control target key start
LH: loop header
LB: loop body
LE: loop exit
PB: predicated region body
PF: predicated region fallthrough
CT: control target
= control target key end

     0   :  { %s2247_s0 = inlined_call_operand.hbm [shape: f32[4,512], index: 0, kind: input, shape index: {}]   ;;  %s2248_s1 = inlined_call_operand.vmem [shape: f32[2,36], index: 1, kind: input, shape index: {}]   ;;  %s2249_s2 = inlined_call_operand.vmem [shape: f32[2,1], index: 2, kind: input, shape index: {}]   ;;  %s2250_s3 = inlined_call_operand.hbm [shape: f32[9,512], index: 3, kind: input, shape index: {}]   ;;  %s2251_s4 = inlined_call_operand.vmem [shape: f32[2,128], index: 4, kind: input, shape index: {}]   ;;  %s2252_s5 = inlined_call_operand.hbm [shape: f32[512,128], index: 5, kind: input, shape index: {}]   ;;  %s2253_s6 = inlined_call_operand.vmem [shape: f32[1,18], index: 6, kind: input, shape index: {}]   ;;  %s2254_s7 = inlined_call_operand.<no memory space> [shape: f32[1,1], index: 7, kind: input, shape index: {}]   ;;  %s2255_s8 = inlined_call_operand.hbm [shape: f32[9,128], index: 8, kind: input, shape index: {}]   ;;  %s2256_s9 = inlined_call_operand.vmem [shape: f32[2,128], index: 9, kind: input, shape index: {}]   ;;  %s2257_s10 = inlined_call_operand.hbm [shape: f32[128,128], index: 10, kind: input, shape index: {}]   ;;  %s2258_s11 = inlined_call_operand.hbm [shape: f32[1,128], index: 11, kind: output, shape index: {}]  }
   0x1   :  { %v16_v0 = vstv %s2254_s7 }
   0x2   :  { %17 = vst [vmem:[#allocation7] sm:$0x1] %v16_v0 }
   0x3   :  { %18 = vsyncpa [#allocation9], 0 }
   0x4   :  { %19 = vsyncpa [#allocation12], 0 }
   0x5   :  { %20 = vsyncpa [#allocation15], 0  ;;  %s41_s21 = sshll.u32 %s2250_s3, 4  ;;  %s42_s21 = int_to_ptr.hbm [resolvable:$true] %s41_s21 }
   0x6   :  { %21 = vsyncpa [#allocation10], 0  ;;  %s1782_s22 = smov [#allocation11]   ;;  %s1783_s24 = smov 512  }
   0x7   :  { %s43_s23 = sshll.u32 %s1782_s22, 4  ;;  %s1784_s25 = smov 32   ;;  %s44_s23 = int_to_ptr.vmem [resolvable:$true] %s43_s23 }
   0x8   :  { %49 = dma.hbm_to_vmem [thread:$0]  %s42_s21, 1024, %s44_s23, [#allocation12], %s1783_s24, %s1783_s24, %s1784_s25  }
   0x9   :  { %s73_s7 = sshll.u32 %s2255_s8, 4  ;;  %s1785_s28 = smov [#allocation14]   ;;  %s74_s7 = int_to_ptr.hbm [resolvable:$true] %s73_s7 }
   0xa   :  { %s75_s29 = sshll.u32 %s1785_s28, 4  ;;  %s27_s3 = sshll.u32 %s2247_s0, 4  ;;  %s76_s29 = int_to_ptr.vmem [resolvable:$true] %s75_s29  ;;  %s28_s3 = int_to_ptr.hbm [resolvable:$true] %s27_s3 }
   0xb   :  { %s1786_s13 = smov 128   ;;  %s1787_s14 = smov 8  }
   0xc   :  { %81 = dma.hbm_to_vmem [thread:$0]  %s74_s7, 256, %s76_s29, [#allocation15], %s1786_s13, %s1786_s13, %s1787_s14  }
   0xd   :  { %s56_s17 = sshll.u32 %s2252_s5, 4  ;;  %s1788_s18 = smov [#allocation8]   ;;  %s57_s17 = int_to_ptr.hbm [resolvable:$true] %s56_s17 }
   0xe   :  { %s29_s19 = sshll.u32 %s1788_s18, 4  ;;  %s1789_s8 = smov [#allocation13]   ;;  %s30_s19 = int_to_ptr.vmem [resolvable:$true] %s29_s19 }
   0xf   :  { %32 = dma.hbm_to_vmem [thread:$0]  %s28_s3, 256, %s30_s19, [#allocation9]  }
  0x10   :  { %s58_s20 = sshll.u32 %s1789_s8, 4  ;;  %s88_s0 = sshll.u32 %s2257_s10, 4  ;;  %s59_s20 = int_to_ptr.vmem [resolvable:$true] %s58_s20  ;;  %s89_s0 = int_to_ptr.hbm [resolvable:$true] %s88_s0 }
  0x11   :  { %64 = dma.hbm_to_vmem [thread:$0]  %s57_s17, 8192, %s59_s20, [#allocation12], %s1786_s13, %s1786_s13, %s1787_s14  }
  0x12   :  { %s1790_s23 = smov [#allocation16]  }
  0x13   :  { %s90_s24 = sshll.u32 %s1790_s23, 4  ;;  %s91_s24 = int_to_ptr.vmem [resolvable:$true] %s90_s24 }
  0x14   :  { %96 = dma.hbm_to_vmem [thread:$0]  %s89_s0, 2048, %s91_s24, [#allocation15], %s1786_s13, %s1786_s13, %s1787_s14  }
  0x15   :  { %1774 = dma.done.wait [#allocation9], 256  }
  0x16   :  { %1775 = vsyncadd [#allocation9], 4294967040 }
  0x17   :  { %1776 = dma.done.wait [#allocation12], 9216  }
  0x18   :  { %1777 = vsyncadd [#allocation12], 4294958080 }
  0x19   :  { %1778 = dma.done.wait [#allocation15], 2304  }
  0x1a   :  { %1779 = vsyncadd [#allocation15], 4294964992  ;;  %v117_v1 = vld [vmem:[#allocation8] sm:$0xff]  ;;  %s1791_s5 = smov 17   ;;  %vm133_vm0 = vcmask 1043456   ;;  %s1792_s10 = smov 2  }
  0x1b   :  { %v250_v2 = vld [vmem:[#allocation11 + $0x2] ss:$8 sm:$0xf]  ;;  %125 = vrot.lane.b32.xlu0 %v117_v1, %s1791_s5  ;;  %v183_v5 = vld [vmem:[#allocation11 + $0x1] ss:$8 sm:$0xf] }
  0x1c   :  { %v252_v3 = vperm.slane %v250_v2, 0  ;;  %v253_v4 = vperm.slane %v250_v2, 1  ;;  %v185_v6 = vperm.slane %v183_v5, 0  ;;  %v186_v7 = vperm.slane %v183_v5, 1  ;;  %v118_v15 = vld [vmem:[#allocation8 + $0x8] sm:$0xff]  ;;  %s1793_s26 = smov 1  }
  0x1d   :  { %v255_v9 = vperm.slane %v250_v2, 3  ;;  %v316_v10 = vld [vmem:[#allocation11 + $0x3] ss:$8 sm:$0xf]  ;;  %v188_v12 = vperm.slane %v183_v5, 3  ;;  %v254_v17 = vperm.slane %v250_v2, 2 }
  0x1e   :  { %v256_v8 = vrot.slane %v253_v4, 4  ;;  %v189_v11 = vrot.slane %v186_v7, 4  ;;  %v319_v16 = vperm.slane %v316_v10, 1  ;;  %v187_v19 = vperm.slane %v183_v5, 2  ;;  %s1794_s27 = smov 16   ;;  %s1795_s7 = smov 18  }
  0x1f   :  { %v257_v18 = vrot.slane %v255_v9, 4  ;;  %v190_v20 = vrot.slane %v188_v12, 4  ;;  %v422_v21 = vld [vmem:[#allocation11 + $0x5] ss:$8 sm:$0xf]  ;;  %v318_v22 = vperm.slane %v316_v10, 0 }
  0x20   :  { %v258_v13 = vsel %vm133_vm0, %v252_v3, %v256_v8  ;;  %v191_v14 = vsel %vm133_vm0, %v185_v6, %v189_v11  ;;  %v322_v23 = vrot.slane %v319_v16, 4  ;;  %v425_v25 = vperm.slane %v422_v21, 1  ;;  %v489_v34 = vld [vmem:[#allocation11 + $0x6] ss:$8 sm:$0xf]  ;;  %s1796_s28 = smov 33  }
  0x21   :  { %260 = vrot.lane.b32.xlu2 %v258_v13, %s1792_s10  ;;  %193 = vrot.lane.b32.xlu1 %v191_v14, %s1793_s26  ;;  %v259_v24 = vsel %vm133_vm0, %v254_v17, %v257_v18  ;;  %v192_v26 = vsel %vm133_vm0, %v187_v19, %v190_v20  ;;  %v321_v27 = vperm.slane %v316_v10, 3  ;;  %v427_v29 = vperm.slane %v422_v21, 3  ;;  %v555_v39 = vld [vmem:[#allocation11 + $0x7] ss:$8 sm:$0xf]  ;;  %s1797_s29 = smov 34  }
  0x22   :  { %v324_v28 = vsel %vm133_vm0, %v318_v22, %v322_v23  ;;  %v424_v30 = vperm.slane %v422_v21, 0  ;;  %v428_v31 = vrot.slane %v425_v25, 4  ;;  %v320_v32 = vperm.slane %v316_v10, 2  ;;  %v622_v48 = vld [vmem:[#allocation11 + $0x20] ss:$8 sm:$0xf] }
  0x23   :  { %127 = vrot.lane.b32.xlu0 %v118_v15, %s1791_s5  ;;  %v323_v33 = vrot.slane %v321_v27, 4  ;;  %v426_v35 = vperm.slane %v422_v21, 2  ;;  %v429_v36 = vrot.slane %v427_v29, 4  ;;  %v494_v38 = vperm.slane %v489_v34, 3  ;;  %s1799_s30 = smov 127   ;;  %s1800_s12 = smov 126  }
  0x24   :  { %v430_v37 = vsel %vm133_vm0, %v424_v30, %v428_v31  ;;  %v492_v41 = vperm.slane %v489_v34, 1  ;;  %v558_v43 = vperm.slane %v555_v39, 1  ;;  %v493_v44 = vperm.slane %v489_v34, 2  ;;  %v148_v3 = vld [vmem:[#allocation11] ss:$8 sm:$0xf] }
  0x25   :  { %v325_v40 = vsel %vm133_vm0, %v320_v32, %v323_v33  ;;  %v431_v42 = vsel %vm133_vm0, %v426_v35, %v429_v36  ;;  %v496_v45 = vrot.slane %v494_v38, 4  ;;  %v491_v46 = vperm.slane %v489_v34, 0  ;;  %s1801_s3 = smov 112   ;;  %s1802_s13 = smov 110  }
  0x26   :  { %v495_v47 = vrot.slane %v492_v41, 4  ;;  %v557_v49 = vperm.slane %v555_v39, 0  ;;  %v561_v50 = vrot.slane %v558_v43, 4  ;;  %v625_v52 = vperm.slane %v622_v48, 1  ;;  %s1803_s14 = smov 111   ;;  %s1804_s15 = smov 96  }
  0x27   :  { %v498_v51 = vsel %vm133_vm0, %v493_v44, %v496_v45  ;;  %v560_v54 = vperm.slane %v555_v39, 3  ;;  %v627_v56 = vperm.slane %v622_v48, 3  ;;  %v624_v57 = vperm.slane %v622_v48, 0  ;;  %s1805_s16 = smov 95   ;;  %s1806_s17 = smov 94  }
  0x28   :  { %v497_v53 = vsel %vm133_vm0, %v491_v46, %v495_v47  ;;  %v563_v55 = vsel %vm133_vm0, %v557_v49, %v561_v50  ;;  %v628_v58 = vrot.slane %v625_v52, 4  ;;  %v559_v59 = vperm.slane %v555_v39, 2  ;;  %s1809_s0 = smov 36   ;;  %s1810_s23 = smov 4  }
  0x29   :  { %262 = vrot.lane.b32.xlu2 %v259_v24, %s1792_s10  ;;  %195 = vrot.lane.b32.xlu1 %v192_v26, %s1793_s26  ;;  %v562_v60 = vrot.slane %v560_v54, 4  ;;  %v626_v61 = vperm.slane %v622_v48, 2  ;;  %v629_v62 = vrot.slane %v627_v56, 4  ;;  %v1798_v2 = vmov 0.0   ;;  %s1812_s24 = smov 108   ;;  %s1813_s5 = smov 92  }
  0x2a   :  { %v630_v63 = vsel %vm133_vm0, %v624_v57, %v628_v58  ;;  %119 = vst [vmem:[#allocation2] sm:$0xff] %v1798_v2  ;;  %vm808_vm1 = vcmask 132096   ;;  %vm121_vm2 = vcmask 273408   ;;  %vm139_vm3 = vcmask 1043592  }
  0x2b   :  { %326 = vrot.lane.b32.xlu0 %v324_v28, %s1794_s27  ;;  %v564_v0 = vsel %vm133_vm0, %v559_v59, %v562_v60  ;;  %v631_v1 = vsel %vm133_vm0, %v626_v61, %v629_v62  ;;  %809 = vst.msk [vmem:[#allocation4 + $0x8] sm:$0x3] %vm808_vm1, %v1798_v2  ;;  %vm140_vm4 = vcmask 1047556   ;;  %vm131_vm5 = vcmask 138240  }
  0x2c   :  { %122 = vst.msk [vmem:[#allocation2 + $0x10] sm:$0xf] %vm121_vm2, %v1798_v2  ;;  %vm141_vm6 = vmor %vm140_vm4, %vm139_vm3  ;;  %v151_v5 = vperm.slane %v148_v3, 1  ;;  %v153_v8 = vperm.slane %v148_v3, 3  ;;  %v150_v9 = vperm.slane %v148_v3, 0  ;;  %v152_v12 = vperm.slane %v148_v3, 2 }
  0x2d   :  { %vm144_vm7 = vcmask 134144   ;;  %vm199_vm8 = vcmask 7168   ;;  %vm266_vm9 = vcmask 15360   ;;  %vm332_vm10 = vcmask 130048  }
  0x2e   :  { %v154_v10 = vrot.slane %v151_v5, 4  ;;  %v155_v13 = vrot.slane %v153_v8, 4  ;;  %vm438_vm11 = vcmask 146432   ;;  %vm505_vm12 = vcmask 261120  }
  0x2f   :  { %vm571_vm13 = vcmask 269312   ;;  %vm638_vm14 = vcmask 277504   ;;  %vm2259_vm15 = vcmask 916480   ;;  %vm233_vm1 = vcmask 1039360  }
  0x30   :  { %v156_v15 = vsel %vm133_vm0, %v150_v9, %v154_v10  ;;  %v157_v18 = vsel %vm133_vm0, %v152_v12, %v155_v13  ;;  %vm299_vm2 = vcmask 1031168   ;;  %vm405_vm3 = vcmask 908288  }
  0x31   :  { %432 = vrot.lane.b32.xlu2 %v430_v37, %s1795_s7  ;;  %328 = vrot.lane.b32.xlu1 %v325_v40, %s1794_s27  ;;  %vm472_vm4 = vcmask 900096  }
  0x33   :  { %434 = vrot.lane.b32.xlu0 %v431_v42, %s1795_s7 }
  0x39   :  { %501 = vrot.lane.b32.xlu2 %v498_v51, %s1784_s25  ;;  %499 = vrot.lane.b32.xlu1 %v497_v53, %s1784_s25 }
  0x3b   :  { %565 = vrot.lane.b32.xlu0 %v563_v55, %s1796_s28 }
  0x41   :  { %632 = vrot.lane.b32.xlu2 %v630_v63, %s1797_s29  ;;  %567 = vrot.lane.b32.xlu1 %v564_v0, %s1796_s28 }
  0x43   :  { %634 = vrot.lane.b32.xlu0 %v631_v1, %s1797_s29 }
  0x7b   :  { %v261_v20 = vpop.permute.xlu2 %260 }
  0x7c   :  { %v264_v32 = vrot.slane %v261_v20, 4 }
  0x7e   :  { %v267_v41 = vsel %vm266_vm9, %v264_v32, %v261_v20 }
  0x83   :  { %v263_v33 = vpop.permute.xlu2 %262 }
  0x84   :  { %v265_v36 = vrot.slane %v263_v33, 4 }
  0x86   :  { %v268_v42 = vsel %vm133_vm0, %v264_v32, %v265_v36 }
  0x87   :  { %v269_v45 = vsel %vm266_vm9, %v268_v42, %v263_v33 }
  0x8d   :  { %v126_v4 = vpop.permute.xlu0 %125 }
  0x8e   :  { %v129_v6 = vrot.slane %v126_v4, 4 }
  0x90   :  { %v132_v7 = vsel %vm131_vm5, %v129_v6, %v126_v4 }
  0x91   :  { %142 = vst.msk [vmem:[#allocation2] sm:$0xff] %vm141_vm6, %v132_v7  ;;  %v433_v7 = vpop.permute.xlu2 %432  ;;  %vm605_vm6 = vcmask 777216  }
  0x92   :  { %v436_v8 = vrot.slane %v433_v7, 4 }
  0x93   :  { %v194_v11 = vpop.permute.xlu1 %193 }
  0x94   :  { %v197_v26 = vrot.slane %v194_v11, 4 }
  0x95   :  { %v128_v14 = vpop.permute.xlu0 %127 }
  0x96   :  { %v130_v16 = vrot.slane %v128_v14, 4  ;;  %v200_v31 = vsel %vm199_vm8, %v197_v26, %v194_v11 }
  0x98   :  { %v1923_v17 = vld [vmem:[#allocation2] sm:$0xff]  ;;  %v134_v19 = vsel %vm133_vm0, %v129_v6, %v130_v16  ;;  %145 = vst.msk [vmem:[#allocation2 + $0x10] sm:$0xf] %vm144_vm7, %v130_v16  ;;  %v439_v16 = vsel %vm438_vm11, %v436_v8, %v433_v7  ;;  %vm538_vm7 = vcmask 785408  }
  0x99   :  { %v160_v21 = vmul.f32 %v156_v15, %v1923_v17  ;;  %v1929_v22 = vsel %vm131_vm5, %v134_v19, %v128_v14  ;;  %v206_v34 = vmul.f32 %v200_v31, %v1923_v17  ;;  %v273_v46 = vmul.f32 %v267_v41, %v1923_v17 }
  0x9a   :  { %v161_v23 = vmul.f32 %v157_v18, %v1929_v22  ;;  %v274_v52 = vmul.f32 %v269_v45, %v1929_v22  ;;  %v445_v20 = vmul.f32 %v439_v16, %v1923_v17  ;;  %vm2260_vm5 = vcmask 769024  }
  0x9b   :  { %164 = vst [vmem:[#allocation1] ss:$2 sm:$0xff] %v160_v21  ;;  %v196_v24 = vpop.permute.xlu1 %195 }
  0x9c   :  { %v198_v25 = vrot.slane %v196_v24, 4  ;;  %166 = vst [vmem:[#allocation1 + $0x10] ss:$2 sm:$0xff] %v161_v23 }
  0x9d   :  { %v327_v43 = vpop.permute.xlu0 %326 }
  0x9e   :  { %v201_v27 = vsel %vm133_vm0, %v197_v26, %v198_v25  ;;  %v330_v48 = vrot.slane %v327_v43, 4  ;;  %v502_v26 = vpop.permute.xlu2 %501 }
  0x9f   :  { %v181_v28 = vld [vmem:[#allocation2 + $0x10] sm:$0xf]  ;;  %v202_v35 = vsel %vm199_vm8, %v201_v27, %v196_v24  ;;  %v504_v27 = vrot.slane %v502_v26, 4  ;;  %vm711_vm8 = vcmask 293888  }
  0xa0   :  { %v208_v39 = vmul.f32 %v198_v25, %v181_v28  ;;  %v207_v40 = vmul.f32 %v202_v35, %v1929_v22  ;;  %v248_v47 = vld [vmem:[#allocation2 + $0x10] sm:$0xf]  ;;  %v333_v57 = vsel %vm332_vm10, %v330_v48, %v327_v43 }
  0xa1   :  { %v275_v53 = vmul.f32 %v265_v36, %v248_v47  ;;  %v339_v59 = vmul.f32 %v333_v57, %v1923_v17  ;;  %v314_v63 = vld [vmem:[#allocation2 + $0x10] sm:$0xf] }
  0xa2   :  { %v167_v29 = vld.sshfl [vmem:[#allocation1] sm:$0xff pattern:$0x75316420]  ;;  %v168_v30 = vld.sshfl [vmem:[#allocation1 + $0x8] sm:$0xff pattern:$0x75316420] }
  0xa3   :  { %175 = vst [vmem:[#allocation3] sm:$0xf] %v167_v29  ;;  %v169_v37 = vld.sshfl [vmem:[#allocation1 + $0x10] sm:$0xff pattern:$0x75316420]  ;;  %v329_v44 = vpop.permute.xlu1 %328 }
  0xa4   :  { %176 = vst [vmem:[#allocation3 + $0x38] sm:$0xf] %v168_v30  ;;  %v170_v38 = vld.sshfl [vmem:[#allocation1 + $0x18] sm:$0xff pattern:$0x75316420]  ;;  %v331_v49 = vrot.slane %v329_v44, 4 }
  0xa5   :  { %213 = vst [vmem:[#allocation1 + $0x1] ss:$2 sm:$0xff] %v206_v34  ;;  %v435_v6 = vpop.permute.xlu0 %434  ;;  %v381_v12 = vld [vmem:[#allocation2 + $0x10] sm:$0xf] }
  0xa6   :  { %177 = vst [vmem:[#allocation3 + $0x50] sm:$0xf] %v169_v37  ;;  %v334_v58 = vsel %vm133_vm0, %v330_v48, %v331_v49  ;;  %v341_v4 = vmul.f32 %v331_v49, %v314_v63  ;;  %v437_v9 = vrot.slane %v435_v6, 4  ;;  %v420_v28 = vld [vmem:[#allocation2 + $0x10] sm:$0xf]  ;;  %v633_v49 = vpop.permute.xlu2 %632 }
  0xa7   :  { %178 = vst [vmem:[#allocation3 + $0x18] sm:$0xf] %v170_v38  ;;  %v335_v60 = vsel %vm332_vm10, %v334_v58, %v329_v44  ;;  %v487_v38 = vld [vmem:[#allocation2 + $0x10] sm:$0xf] }
  0xa8   :  { %215 = vst [vmem:[#allocation1 + $0x11] ss:$2 sm:$0xff] %v207_v40  ;;  %v340_v0 = vmul.f32 %v335_v60, %v1929_v22  ;;  %v440_v18 = vsel %vm133_vm0, %v436_v8, %v437_v9  ;;  %v447_v31 = vmul.f32 %v437_v9, %v420_v28 }
  0xa9   :  { %217 = vst [vmem:[#allocation1 + $0x21] ss:$2 sm:$0xff] %v208_v39  ;;  %v441_v21 = vsel %vm438_vm11, %v440_v18, %v435_v6 }
  0xaa   :  { %v446_v29 = vmul.f32 %v441_v21, %v1929_v22  ;;  %v893_v21 = vld [vmem:[#allocation4 + $0x8] sm:$0x3] }
  0xab   :  { %v500_v13 = vpop.permute.xlu1 %499 }
  0xac   :  { %v1939_v50 = vld.sshfl [vmem:[#allocation1] sm:$0xff pattern:$0x75316420]  ;;  %v219_v51 = vld.sshfl [vmem:[#allocation1 + $0x8] sm:$0xff pattern:$0x75316420] }
  0xad   :  { %279 = vst [vmem:[#allocation1] ss:$2 sm:$0xff] %v273_v46  ;;  %225 = vrot.lane.b32.xlu0 %v219_v51, %s1799_s30  ;;  %v503_v23 = vrot.slane %v500_v13, 4  ;;  %v566_v30 = vpop.permute.xlu0 %565  ;;  %v514_v46 = vmul.f32 %v504_v27, %v487_v38 }
  0xae   :  { %v569_v41 = vrot.slane %v566_v30, 4 }
  0xaf   :  { %v220_v54 = vld.sshfl [vmem:[#allocation1 + $0x10] sm:$0xff pattern:$0x75316420]  ;;  %v1943_v55 = vld.sshfl [vmem:[#allocation1 + $0x18] sm:$0xff pattern:$0x75316420]  ;;  %v506_v34 = vsel %vm505_vm12, %v503_v23, %v500_v13  ;;  %v507_v35 = vsel %vm133_vm0, %v503_v23, %v504_v27 }
  0xb0   :  { %v222_v56 = vld.sshfl [vmem:[#allocation1 + $0x20] sm:$0xff pattern:$0x75316420]  ;;  %281 = vst [vmem:[#allocation1 + $0x10] ss:$2 sm:$0xff] %v274_v52  ;;  %v508_v39 = vsel %vm505_vm12, %v507_v35, %v502_v26  ;;  %v512_v40 = vmul.f32 %v506_v34, %v1923_v17  ;;  %v572_v51 = vsel %vm571_vm13, %v569_v41, %v566_v30 }
  0xb1   :  { %283 = vst [vmem:[#allocation1 + $0x20] ss:$2 sm:$0xff] %v275_v53  ;;  %231 = vrot.lane.b32.xlu2 %v222_v56, %s1799_s30  ;;  %v513_v45 = vmul.f32 %v508_v39, %v1929_v22  ;;  %v578_v56 = vmul.f32 %v572_v51, %v1923_v17 }
  0xb3   :  { %v568_v36 = vpop.permute.xlu1 %567 }
  0xb4   :  { %v1950_v61 = vld.sshfl [vmem:[#allocation1] sm:$0xff pattern:$0x75316420]  ;;  %v285_v62 = vld.sshfl [vmem:[#allocation1 + $0x8] sm:$0xff pattern:$0x75316420] }
  0xb5   :  { %346 = vst [vmem:[#allocation1 + $0x1] ss:$2 sm:$0xff] %v339_v59  ;;  %v570_v42 = vrot.slane %v568_v36, 4  ;;  %v635_v53 = vpop.permute.xlu0 %634 }
  0xb6   :  { %v637_v58 = vrot.slane %v635_v53, 4 }
  0xb7   :  { %v286_v1 = vld.sshfl [vmem:[#allocation1 + $0x10] sm:$0xff pattern:$0x75316420]  ;;  %v1953_v3 = vld.sshfl [vmem:[#allocation1 + $0x18] sm:$0xff pattern:$0x75316420]  ;;  %v573_v52 = vsel %vm133_vm0, %v569_v41, %v570_v42 }
  0xb8   :  { %v288_v5 = vld.sshfl [vmem:[#allocation1 + $0x20] sm:$0xff pattern:$0x75316420]  ;;  %348 = vst [vmem:[#allocation1 + $0x11] ss:$2 sm:$0xff] %v340_v0  ;;  %v574_v57 = vsel %vm571_vm13, %v573_v52, %v568_v36  ;;  %vm817_vm13 = vcmask 1041408  }
  0xb9   :  { %350 = vst [vmem:[#allocation1 + $0x21] ss:$2 sm:$0xff] %v341_v4  ;;  %297 = vrot.lane.b32.xlu1 %v288_v5, %s1800_s12  ;;  %291 = vrot.lane.b32.xlu2 %v285_v62, %s1800_s12  ;;  %v553_v62 = vld [vmem:[#allocation2 + $0x10] sm:$0xf]  ;;  %v579_v63 = vmul.f32 %v574_v57, %v1929_v22 }
  0xba   :  { %v580_v0 = vmul.f32 %v570_v42, %v553_v62 }
  0xbc   :  { %v1957_v10 = vld.sshfl [vmem:[#allocation1] sm:$0xff pattern:$0x75316420]  ;;  %v352_v11 = vld.sshfl [vmem:[#allocation1 + $0x8] sm:$0xff pattern:$0x75316420] }
  0xbd   :  { %385 = vst [vmem:[#allocation1] ss:$2 sm:$0xff] %v1923_v17 }
  0xbf   :  { %v353_v14 = vld.sshfl [vmem:[#allocation1 + $0x10] sm:$0xff pattern:$0x75316420]  ;;  %v354_v15 = vld.sshfl [vmem:[#allocation1 + $0x18] sm:$0xff pattern:$0x75316420] }
  0xc0   :  { %v355_v19 = vld.sshfl [vmem:[#allocation1 + $0x20] sm:$0xff pattern:$0x75316420]  ;;  %387 = vst [vmem:[#allocation1 + $0x10] ss:$2 sm:$0xff] %v1929_v22 }
  0xc1   :  { %364 = vrot.lane.b32.xlu0 %v355_v19, %s1801_s3  ;;  %389 = vst [vmem:[#allocation1 + $0x20] ss:$2 sm:$0xff] %v381_v12  ;;  %227 = vrot.lane.b32.xlu1 %v220_v54, %s1799_s30  ;;  %v620_v12 = vld [vmem:[#allocation2 + $0x10] sm:$0xf] }
  0xc2   :  { %360 = vrot.lane.b32.xlu2 %v353_v14, %s1801_s3  ;;  %v647_v14 = vmul.f32 %v637_v58, %v620_v12 }
  0xc4   :  { %v1968_v24 = vld.sshfl [vmem:[#allocation1 + $0x8] sm:$0xff pattern:$0x75316420]  ;;  %v1970_v25 = vld.sshfl [vmem:[#allocation1] sm:$0xff pattern:$0x75316420] }
  0xc5   :  { %452 = vst [vmem:[#allocation1 + $0x1] ss:$2 sm:$0xff] %v445_v20 }
  0xc7   :  { %v392_v32 = vld.sshfl [vmem:[#allocation1 + $0x10] sm:$0xff pattern:$0x75316420]  ;;  %v1973_v33 = vld.sshfl [vmem:[#allocation1 + $0x18] sm:$0xff pattern:$0x75316420] }
  0xc8   :  { %v394_v37 = vld.sshfl [vmem:[#allocation1 + $0x20] sm:$0xff pattern:$0x75316420]  ;;  %454 = vst [vmem:[#allocation1 + $0x11] ss:$2 sm:$0xff] %v446_v29 }
  0xc9   :  { %229 = vrot.lane.b32.xlu1 %v1943_v55, %s1799_s30  ;;  %293 = vrot.lane.b32.xlu0 %v286_v1, %s1800_s12  ;;  %456 = vst [vmem:[#allocation1 + $0x21] ss:$2 sm:$0xff] %v447_v31  ;;  %v636_v55 = vrot.slane %v633_v49, 4 }
  0xca   :  { %362 = vrot.lane.b32.xlu2 %v354_v15, %s1801_s3 }
  0xcb   :  { %v639_v4 = vsel %vm638_vm14, %v636_v55, %v633_v49  ;;  %v640_v5 = vsel %vm133_vm0, %v636_v55, %v637_v58 }
  0xcc   :  { %v458_v43 = vld.sshfl [vmem:[#allocation1 + $0x8] sm:$0xff pattern:$0x75316420]  ;;  %v1983_v44 = vld.sshfl [vmem:[#allocation1] sm:$0xff pattern:$0x75316420]  ;;  %v645_v7 = vmul.f32 %v639_v4, %v1923_v17  ;;  %v641_v8 = vsel %vm638_vm14, %v640_v5, %v635_v53 }
  0xcd   :  { %518 = vst [vmem:[#allocation1] ss:$2 sm:$0xff] %v512_v40  ;;  %v646_v13 = vmul.f32 %v641_v8, %v1929_v22  ;;  %v825_v17 = vld [vmem:[#allocation4 + $0x8] sm:$0x3] }
  0xce   :  { %v859_v22 = vld [vmem:[#allocation4 + $0x8] sm:$0x3] }
  0xcf   :  { %v459_v47 = vld.sshfl [vmem:[#allocation1 + $0x10] sm:$0xff pattern:$0x75316420]  ;;  %v460_v48 = vld.sshfl [vmem:[#allocation1 + $0x18] sm:$0xff pattern:$0x75316420] }
  0xd0   :  { %v461_v54 = vld.sshfl [vmem:[#allocation1 + $0x20] sm:$0xff pattern:$0x75316420]  ;;  %520 = vst [vmem:[#allocation1 + $0x10] ss:$2 sm:$0xff] %v513_v45 }
  0xd1   :  { %295 = vrot.lane.b32.xlu0 %v1953_v3, %s1800_s12  ;;  %358 = vrot.lane.b32.xlu1 %v352_v11, %s1801_s3  ;;  %522 = vst [vmem:[#allocation1 + $0x20] ss:$2 sm:$0xff] %v514_v46 }
  0xd2   :  { %470 = vrot.lane.b32.xlu2 %v461_v54, %s1802_s13 }
  0xd4   :  { %v524_v59 = vld.sshfl [vmem:[#allocation1 + $0x8] sm:$0xff pattern:$0x75316420]  ;;  %v1994_v60 = vld.sshfl [vmem:[#allocation1] sm:$0xff pattern:$0x75316420] }
  0xd5   :  { %585 = vst [vmem:[#allocation1 + $0x1] ss:$2 sm:$0xff] %v578_v56 }
  0xd7   :  { %v525_v1 = vld.sshfl [vmem:[#allocation1 + $0x10] sm:$0xff pattern:$0x75316420]  ;;  %v526_v3 = vld.sshfl [vmem:[#allocation1 + $0x18] sm:$0xff pattern:$0x75316420] }
  0xd8   :  { %v527_v6 = vld.sshfl [vmem:[#allocation1 + $0x20] sm:$0xff pattern:$0x75316420]  ;;  %587 = vst [vmem:[#allocation1 + $0x11] ss:$2 sm:$0xff] %v579_v63 }
  0xd9   :  { %403 = vrot.lane.b32.xlu0 %v394_v37, %s1803_s14  ;;  %397 = vrot.lane.b32.xlu1 %v1968_v24, %s1803_s14  ;;  %589 = vst [vmem:[#allocation1 + $0x21] ss:$2 sm:$0xff] %v580_v0 }
  0xda   :  { %399 = vrot.lane.b32.xlu2 %v392_v32, %s1803_s14 }
  0xdc   :  { %v590_v9 = vld.sshfl [vmem:[#allocation1] sm:$0xff pattern:$0x75316420]  ;;  %v591_v11 = vld.sshfl [vmem:[#allocation1 + $0x8] sm:$0xff pattern:$0x75316420] }
  0xdd   :  { %651 = vst [vmem:[#allocation1] ss:$2 sm:$0xff] %v645_v7 }
  0xdf   :  { %v592_v15 = vld.sshfl [vmem:[#allocation1 + $0x10] sm:$0xff pattern:$0x75316420]  ;;  %v593_v16 = vld.sshfl [vmem:[#allocation1 + $0x18] sm:$0xff pattern:$0x75316420] }
  0xe0   :  { %v594_v18 = vld.sshfl [vmem:[#allocation1 + $0x20] sm:$0xff pattern:$0x75316420]  ;;  %653 = vst [vmem:[#allocation1 + $0x10] ss:$2 sm:$0xff] %v646_v13 }
  0xe1   :  { %464 = vrot.lane.b32.xlu0 %v458_v43, %s1802_s13  ;;  %466 = vrot.lane.b32.xlu1 %v459_v47, %s1802_s13  ;;  %655 = vst [vmem:[#allocation1 + $0x20] ss:$2 sm:$0xff] %v647_v14 }
  0xe2   :  { %401 = vrot.lane.b32.xlu2 %v1973_v33, %s1803_s14 }
  0xe4   :  { %v657_v27 = vld.sshfl [vmem:[#allocation1 + $0x8] sm:$0xff pattern:$0x75316420]  ;;  %v656_v28 = vld.sshfl [vmem:[#allocation1] sm:$0xff pattern:$0x75316420] }
  0xe7   :  { %v658_v24 = vld.sshfl [vmem:[#allocation1 + $0x10] sm:$0xff pattern:$0x75316420]  ;;  %v659_v26 = vld.sshfl [vmem:[#allocation1 + $0x18] sm:$0xff pattern:$0x75316420] }
  0xe8   :  { %v660_v19 = vld.sshfl [vmem:[#allocation1 + $0x20] sm:$0xff pattern:$0x75316420] }
  0xe9   :  { %530 = vrot.lane.b32.xlu0 %v524_v59, %s1804_s15  ;;  %468 = vrot.lane.b32.xlu1 %v460_v48, %s1802_s13  ;;  %830 = vst [vmem:[#allocation1 + $0x20] ss:$4 sm:$0xff] %v825_v17 }
  0xea   :  { %536 = vrot.lane.b32.xlu2 %v527_v6, %s1804_s15 }
  0xf0   :  { %v2013_v20 = vld.sshfl [vmem:[#allocation1 + $0x20] sm:$0xff pattern:$0x73625140] }
  0xf1   :  { %603 = vrot.lane.b32.xlu1 %v594_v18, %s1805_s16  ;;  %669 = vrot.lane.b32.xlu0 %v660_v19, %s1806_s17  ;;  %864 = vst [vmem:[#allocation1 + $0x20] ss:$4 sm:$0xff] %v859_v22 }
  0xf2   :  { %597 = vrot.lane.b32.xlu2 %v591_v11, %s1805_s16 }
  0xf8   :  { %v2016_v23 = vld.sshfl [vmem:[#allocation1 + $0x20] sm:$0xff pattern:$0x73625140] }
  0xf9   :  { %532 = vrot.lane.b32.xlu1 %v525_v1, %s1804_s15  ;;  %599 = vrot.lane.b32.xlu0 %v592_v15, %s1805_s16  ;;  %898 = vst [vmem:[#allocation1 + $0x20] ss:$4 sm:$0xff] %v893_v21 }
  0xfa   :  { %665 = vrot.lane.b32.xlu2 %v658_v24, %s1806_s17 }
 0x101   :  { %534 = vrot.lane.b32.xlu1 %v526_v3, %s1804_s15  ;;  %601 = vrot.lane.b32.xlu0 %v593_v16, %s1805_s16 }
 0x102   :  { %667 = vrot.lane.b32.xlu2 %v659_v26, %s1806_s17 }
 0x109   :  { %663 = vrot.lane.b32.xlu1 %v657_v27, %s1806_s17  ;;  %661 = vrot.lane.b32.xlu0 %v656_v28, %s1806_s17 }
 0x10a   :  { %595 = vrot.lane.b32.xlu2 %v590_v9, %s1805_s16 }
 0x10b   :  { %v232_v29 = vpop.permute.xlu2 %231 }
 0x111   :  { %528 = vrot.lane.b32.xlu1 %v1994_v60, %s1804_s15  ;;  %395 = vrot.lane.b32.xlu0 %v1970_v25, %s1803_s14 }
 0x112   :  { %289 = vrot.lane.b32.xlu2 %v1950_v61, %s1800_s12 }
 0x113   :  { %v2030_v30 = vpop.permute.xlu2 %291 }
 0x119   :  { %462 = vrot.lane.b32.xlu1 %v1983_v44, %s1802_s13  ;;  %356 = vrot.lane.b32.xlu0 %v1957_v10, %s1801_s3 }
 0x11c   :  { %v361_v31 = vpop.permute.xlu2 %360 }
 0x11f   :  { %v2039_v25 = vpop.permute.xlu0 %225 }
 0x121   :  { %223 = vrot.lane.b32.xlu1 %v1939_v50, %s1799_s30 }
 0x124   :  { %v363_v32 = vpop.permute.xlu2 %362 }
 0x125   :  { %v369_v33 = vsel %vm2259_vm15, %v361_v31, %v363_v32 }
 0x126   :  { %377 = vst [vmem:[#allocation3 + $0x78] sm:$0xf0] %v369_v33  ;;  %v1807_v33 = vmov 0  }
 0x127   :  { %1572 = vset.pattern.permute.xlu2 %v1807_v33  ;;  %1603 = vset.pattern.permute.xlu0 %v1807_v33 }
 0x12b   :  { %v298_v61 = vpop.permute.xlu1 %297 }
 0x12c   :  { %v471_v34 = vpop.permute.xlu2 %470 }
 0x133   :  { %v228_v35 = vpop.permute.xlu1 %227  ;;  %v365_v36 = vpop.permute.xlu0 %364 }
 0x134   :  { %v235_v37 = vsel %vm233_vm1, %v2039_v25, %v228_v35  ;;  %v370_v10 = vsel %vm2259_vm15, %v363_v32, %v365_v36  ;;  %v400_v38 = vpop.permute.xlu2 %399 }
 0x135   :  { %243 = vst [vmem:[#allocation3 + $0x38] sm:$0xf0] %v235_v37 }
 0x136   :  { %378 = vst [vmem:[#allocation3 + $0x80] sm:$0xf0] %v370_v10 }
 0x13b   :  { %v230_v50 = vpop.permute.xlu1 %229  ;;  %v294_v39 = vpop.permute.xlu0 %293 }
 0x13c   :  { %v236_v40 = vsel %vm233_vm1, %v228_v35, %v230_v50  ;;  %v237_v41 = vsel %vm233_vm1, %v230_v50, %v232_v29  ;;  %v301_v42 = vsel %vm299_vm2, %v2030_v30, %v294_v39  ;;  %v402_v43 = vpop.permute.xlu2 %401 }
 0x13d   :  { %244 = vst [vmem:[#allocation3 + $0x50] sm:$0xf0] %v236_v40  ;;  %v408_v44 = vsel %vm405_vm3, %v400_v38, %v402_v43 }
 0x13e   :  { %245 = vst [vmem:[#allocation3 + $0x18] sm:$0xf0] %v237_v41  ;;  %v684_v41 = vld [vmem:[%s2248_s1] sm:$0x3] }
 0x13f   :  { %309 = vst [vmem:[#allocation3 + $0x68] sm:$0xf] %v301_v42 }
 0x140   :  { %416 = vst [vmem:[#allocation3 + $0x28] sm:$0xf] %v408_v44 }
 0x143   :  { %v2049_v45 = vpop.permute.xlu1 %358  ;;  %v296_v46 = vpop.permute.xlu0 %295 }
 0x144   :  { %v368_v47 = vsel %vm2259_vm15, %v2049_v45, %v361_v31  ;;  %v302_v48 = vsel %vm299_vm2, %v294_v39, %v296_v46  ;;  %v303_v49 = vsel %vm299_vm2, %v296_v46, %v298_v61  ;;  %v537_v51 = vpop.permute.xlu2 %536  ;;  %v705_v31 = vld [vmem:[%s2249_s2] sm:$0x3] }
 0x145   :  { %376 = vst [vmem:[#allocation3 + $0x68] sm:$0xf0] %v368_v47  ;;  %708 = vperm.xlu2 %1572, %v705_v31   ;;  %v688_v50 = vld [vmem:[#allocation3 + $0x18] sm:$0xff] }
 0x146   :  { %310 = vst [vmem:[#allocation3 + $0x78] sm:$0xf] %v302_v48 }
 0x147   :  { %311 = vst [vmem:[#allocation3 + $0x80] sm:$0xf] %v303_v49 }
 0x14b   :  { %v2055_v52 = vpop.permute.xlu1 %397  ;;  %v404_v53 = vpop.permute.xlu0 %403 }
 0x14c   :  { %v407_v54 = vsel %vm405_vm3, %v2055_v52, %v400_v38  ;;  %v409_v55 = vsel %vm405_vm3, %v402_v43, %v404_v53  ;;  %v598_v56 = vpop.permute.xlu2 %597  ;;  %v690_v43 = vld [vmem:[#allocation3 + $0x68] sm:$0xff] }
 0x14d   :  { %415 = vst [vmem:[#allocation3 + $0x88] sm:$0xf] %v407_v54 }
 0x14e   :  { %417 = vst [vmem:[#allocation3 + $0x40] sm:$0xf] %v409_v55 }
 0x153   :  { %v467_v57 = vpop.permute.xlu1 %466  ;;  %v2060_v58 = vpop.permute.xlu0 %464 }
 0x154   :  { %v474_v59 = vsel %vm472_vm4, %v2060_v58, %v467_v57  ;;  %v666_v60 = vpop.permute.xlu2 %665 }
 0x155   :  { %482 = vst [vmem:[#allocation3 + $0x88] sm:$0xf0] %v474_v59 }
 0x15b   :  { %v469_v62 = vpop.permute.xlu1 %468  ;;  %v531_v63 = vpop.permute.xlu0 %530 }
 0x15c   :  { %v475_v0 = vsel %vm472_vm4, %v467_v57, %v469_v62  ;;  %v476_v1 = vsel %vm472_vm4, %v469_v62, %v471_v34  ;;  %v668_v3 = vpop.permute.xlu2 %667  ;;  %v692_v34 = vld [vmem:[#allocation3 + $0x80] sm:$0xff]  ;;  %v694_v42 = vld [vmem:[#allocation3 + $0x88] sm:$0xff] }
 0x15d   :  { %483 = vst [vmem:[#allocation3 + $0x28] sm:$0xf0] %v475_v0  ;;  %v674_v4 = vsel %vm2260_vm5, %v666_v60, %v668_v3 }
 0x15e   :  { %484 = vst [vmem:[#allocation3 + $0x40] sm:$0xf0] %v476_v1 }
 0x15f   :  { %682 = vst [vmem:[#allocation3 + $0x70] sm:$0xf] %v674_v4 }
 0x163   :  { %v604_v5 = vpop.permute.xlu1 %603  ;;  %v670_v6 = vpop.permute.xlu0 %669 }
 0x164   :  { %v675_v7 = vsel %vm2260_vm5, %v668_v3, %v670_v6  ;;  %v596_v8 = vpop.permute.xlu2 %595  ;;  %v695_v54 = vld [vmem:[#allocation3 + $0x28] sm:$0xff] }
 0x165   :  { %683 = vst [vmem:[#allocation3 + $0x90] sm:$0xf] %v675_v7  ;;  %v606_v9 = vsel %vm605_vm6, %v596_v8, %v598_v56  ;;  %v696_v61 = vld [vmem:[#allocation3 + $0x40] sm:$0xff] }
 0x166   :  { %614 = vst [vmem:[#allocation3 + $0x58] sm:$0xf0] %v606_v9 }
 0x16b   :  { %v533_v11 = vpop.permute.xlu1 %532  ;;  %v600_v12 = vpop.permute.xlu0 %599 }
 0x16c   :  { %v540_v13 = vsel %vm538_vm7, %v531_v63, %v533_v11  ;;  %v607_v14 = vsel %vm605_vm6, %v598_v56, %v600_v12  ;;  %v704_v15 = vld [vmem:[#allocation3 + $0x90] sm:$0xf]  ;;  %v290_v16 = vpop.permute.xlu2 %289  ;;  %v691_v56 = vld [vmem:[#allocation3 + $0x78] sm:$0xff] }
 0x16d   :  { %548 = vst [vmem:[#allocation3 + $0x10] sm:$0xf] %v540_v13  ;;  %1535 = vmatpush.msk.msra.mxu3 %vm133_vm0, %v704_v15  ;;  %v300_v18 = vsel %vm299_vm2, %v290_v16, %v2030_v30  ;;  %v972_v15 = vld [vmem:[#allocation13 + $0x170] sm:$0xff]  ;;  %v971_v16 = vld [vmem:[#allocation13 + $0x168] sm:$0xff] }
 0x16e   :  { %615 = vst [vmem:[#allocation3 + $0x10] sm:$0xf0] %v607_v14  ;;  %v973_v14 = vld [vmem:[#allocation13 + $0x178] sm:$0xff] }
 0x16f   :  { %308 = vst [vmem:[#allocation3 + $0x30] sm:$0xf] %v300_v18 }
 0x173   :  { %v535_v17 = vpop.permute.xlu1 %534  ;;  %v602_v19 = vpop.permute.xlu0 %601 }
 0x174   :  { %v541_v22 = vsel %vm538_vm7, %v533_v11, %v535_v17  ;;  %v542_v21 = vsel %vm538_vm7, %v535_v17, %v537_v51  ;;  %v608_v24 = vsel %vm605_vm6, %v600_v12, %v602_v19  ;;  %v609_v26 = vsel %vm605_vm6, %v602_v19, %v604_v5  ;;  %v686_v51 = vld [vmem:[#allocation3 + $0x38] sm:$0xff] }
 0x175   :  { %549 = vst [vmem:[#allocation3 + $0x98] sm:$0xf] %v541_v22  ;;  %v698_v40 = vld [vmem:[#allocation3 + $0x10] sm:$0xff]  ;;  %vm819_vm6 = vcmask 1045508  }
 0x176   :  { %550 = vst [vmem:[#allocation3 + $0x60] sm:$0xf] %v542_v21 }
 0x177   :  { %616 = vst [vmem:[#allocation3 + $0x98] sm:$0xf0] %v608_v24 }
 0x178   :  { %617 = vst [vmem:[#allocation3 + $0x60] sm:$0xf0] %v609_v26 }
 0x17b   :  { %v664_v27 = vpop.permute.xlu1 %663  ;;  %v662_v28 = vpop.permute.xlu0 %661 }
 0x17c   :  { %v673_v29 = vsel %vm2260_vm5, %v664_v27, %v666_v60  ;;  %v672_v30 = vsel %vm2260_vm5, %v662_v28, %v664_v27 }
 0x17d   :  { %681 = vst [vmem:[#allocation3 + $0x48] sm:$0xf] %v673_v29 }
 0x17e   :  { %680 = vst [vmem:[#allocation3 + $0x20] sm:$0xf] %v672_v30  ;;  %v699_v53 = vld [vmem:[#allocation3 + $0x98] sm:$0xff] }
 0x17f   :  { %v700_v32 = vld [vmem:[#allocation3 + $0x60] sm:$0xff] }
 0x180   :  { %799 = vmatpush.msra.mxu3 %v700_v32 }
 0x182   :  { %800 = vmatpush.msra.mxu3 %v696_v61 }
 0x183   :  { %v529_v35 = vpop.permute.xlu1 %528  ;;  %v396_v36 = vpop.permute.xlu0 %395 }
 0x184   :  { %801 = vmatpush.msra.mxu3 %v692_v34  ;;  %v539_v37 = vsel %vm538_vm7, %v529_v35, %v531_v63  ;;  %v406_v10 = vsel %vm405_vm3, %v396_v36, %v2055_v52  ;;  %v702_v38 = vld [vmem:[#allocation3 + $0x48] sm:$0xf]  ;;  %v703_v52 = vld [vmem:[#allocation3 + $0x70] sm:$0xf] }
 0x185   :  { %547 = vst [vmem:[#allocation3 + $0x58] sm:$0xf] %v539_v37  ;;  %v701_v39 = vld [vmem:[#allocation3 + $0x20] sm:$0xf]  ;;  %1531 = vmatpush.msk.msra.mxu2 %vm133_vm0, %v702_v38  ;;  %v969_v37 = vld [vmem:[#allocation13 + $0x158] sm:$0xff]  ;;  %v968_v38 = vld [vmem:[#allocation13 + $0x150] sm:$0xff] }
 0x186   :  { %802 = vmatpush.msra.mxu3 %v688_v50  ;;  %414 = vst [vmem:[#allocation3 + $0x8] sm:$0xf] %v406_v10  ;;  %1529 = vmatpush.msk.msra.mxu0 %vm133_vm0, %v701_v39  ;;  %v903_v34 = vld.sshfl [vmem:[#allocation1 + $0x20] sm:$0xff pattern:$0x73625140]  ;;  %v941_v10 = vld [vmem:[#allocation13 + $0x78] sm:$0xff] }
 0x187   :  { %759 = vmatpush.msra.mxu2 %v698_v40  ;;  %1536 = vmatmul.msk.f32.vlgmr.msra.gmra.mxu3 %vm711_vm8, %v684_v41  ;;  %v957_v50 = vld [vmem:[#allocation13 + $0xf8] sm:$0xff]  ;;  %v967_v40 = vld [vmem:[#allocation13 + $0x148] sm:$0xff] }
 0x188   :  { %v989_v39 = vld [vmem:[#allocation13 + $0x1f8] sm:$0xff]  ;;  %1010 = vmatpush.msra.mxu1 %v957_v50 }
 0x189   :  { %760 = vmatpush.msra.mxu2 %v694_v42  ;;  %1050 = vmatpush.msrb.mxu3 %v989_v39  ;;  %v956_v42 = vld [vmem:[#allocation13 + $0xf0] sm:$0xff] }
 0x18a   :  { %1011 = vmatpush.msra.mxu1 %v956_v42 }
 0x18b   :  { %v463_v44 = vpop.permute.xlu1 %462  ;;  %761 = vmatpush.msra.mxu2 %v690_v43  ;;  %v357_v46 = vpop.permute.xlu0 %356  ;;  %v966_v43 = vld [vmem:[#allocation13 + $0x140] sm:$0xff] }
 0x18c   :  { %v473_v47 = vsel %vm472_vm4, %v463_v44, %v2060_v58  ;;  %v367_v48 = vsel %vm2259_vm15, %v357_v46, %v2049_v45  ;;  %v697_v49 = vld [vmem:[#allocation3 + $0x58] sm:$0xff]  ;;  %v687_v58 = vld [vmem:[#allocation3 + $0x50] sm:$0xff]  ;;  %v988_v44 = vld [vmem:[#allocation13 + $0x1f0] sm:$0xff] }
 0x18d   :  { %481 = vst [vmem:[#allocation3 + $0x8] sm:$0xf0] %v473_v47  ;;  %739 = vmatpush.msra.mxu0 %v697_v49  ;;  %762 = vmatpush.msra.mxu2 %v686_v51  ;;  %v939_v46 = vld [vmem:[#allocation13 + $0x68] sm:$0xff]  ;;  %v938_v51 = vld [vmem:[#allocation13 + $0x60] sm:$0xff] }
 0x18e   :  { %375 = vst [vmem:[#allocation3 + $0x30] sm:$0xf0] %v367_v48  ;;  %1532 = vmatmul.msk.f32.vlgmr.msra.gmra.mxu2 %vm711_vm8, %v684_v41  ;;  %1051 = vmatpush.msrb.mxu3 %v988_v44  ;;  %v955_v47 = vld [vmem:[#allocation13 + $0xe8] sm:$0xff]  ;;  %v965_v48 = vld [vmem:[#allocation13 + $0x138] sm:$0xff] }
 0x18f   :  { %1533 = vmatpush.msk.msrb.mxu2 %vm133_vm0, %v703_v52  ;;  %1012 = vmatpush.msra.mxu1 %v955_v47  ;;  %v987_v49 = vld [vmem:[#allocation13 + $0x1e8] sm:$0xff]  ;;  %v954_v52 = vld [vmem:[#allocation13 + $0xe0] sm:$0xff] }
 0x190   :  { %1052 = vmatpush.msrb.mxu3 %v987_v49 }
 0x191   :  { %779 = vmatpush.msrb.mxu2 %v699_v53  ;;  %v964_v53 = vld [vmem:[#allocation13 + $0x130] sm:$0xff]  ;;  %1013 = vmatpush.msra.mxu1 %v954_v52 }
 0x193   :  { %780 = vmatpush.msrb.mxu2 %v695_v54  ;;  %v224_v55 = vpop.permute.xlu1 %223  ;;  %v986_v54 = vld [vmem:[#allocation13 + $0x1e0] sm:$0xff] }
 0x194   :  { %v234_v45 = vsel %vm233_vm1, %v224_v55, %v2039_v25  ;;  %v693_v57 = vld [vmem:[#allocation3 + $0x8] sm:$0xff]  ;;  %1053 = vmatpush.msrb.mxu3 %v986_v54 }
 0x195   :  { %781 = vmatpush.msrb.mxu2 %v691_v56  ;;  %242 = vst [vmem:[#allocation3] sm:$0xf0] %v234_v45  ;;  %740 = vmatpush.msra.mxu0 %v693_v57  ;;  %v689_v59 = vld [vmem:[#allocation3 + $0x30] sm:$0xff]  ;;  %v963_v45 = vld [vmem:[#allocation13 + $0x128] sm:$0xff] }
 0x196   :  { %v937_v55 = vld [vmem:[#allocation13 + $0x58] sm:$0xff] }
 0x197   :  { %782 = vmatpush.msrb.mxu2 %v687_v58  ;;  %741 = vmatpush.msra.mxu0 %v689_v59  ;;  %v953_v56 = vld [vmem:[#allocation13 + $0xd8] sm:$0xff]  ;;  %v936_v58 = vld [vmem:[#allocation13 + $0x50] sm:$0xff] }
 0x198   :  { %1534 = vmatmul.msk.f32.vlgmr.msrb.gmra.mxu2 %vm711_vm8, %v684_v41  ;;  %v985_v57 = vld [vmem:[#allocation13 + $0x1d8] sm:$0xff]  ;;  %1014 = vmatpush.msra.mxu1 %v953_v56  ;;  %v952_v59 = vld [vmem:[#allocation13 + $0xd0] sm:$0xff] }
 0x199   :  { %1030 = vmatpush.msra.mxu2 %v973_v14  ;;  %1054 = vmatpush.msrb.mxu3 %v985_v57  ;;  %v959_v14 = vld [vmem:[#allocation13 + $0x108] sm:$0xff] }
 0x19a   :  { %1015 = vmatpush.msra.mxu1 %v952_v59 }
 0x19b   :  { %1031 = vmatpush.msra.mxu2 %v972_v15  ;;  %v981_v15 = vld [vmem:[#allocation13 + $0x1b8] sm:$0xff] }
 0x19c   :  { %v685_v60 = vld [vmem:[#allocation3] sm:$0xff] }
 0x19d   :  { %742 = vmatpush.msra.mxu0 %v685_v60  ;;  %1032 = vmatpush.msra.mxu2 %v971_v16  ;;  %v962_v60 = vld [vmem:[#allocation13 + $0x120] sm:$0xff]  ;;  %v932_v16 = vld [vmem:[#allocation13 + $0x30] sm:$0xff] }
 0x19e   :  { %1530 = vmatmul.msk.f32.vlgmr.msra.gmra.mxu0 %vm711_vm8, %v684_v41  ;;  %v940_v41 = vld [vmem:[#allocation13 + $0x70] sm:$0xff] }
 0x19f   :  { %v709_v0 = vpop.permute.xlu2 %708  ;;  %990 = vmatpush.msrb.mxu0 %v941_v10  ;;  %v974_v10 = vld [vmem:[#allocation13 + $0x180] sm:$0xff] }
 0x1a1   :  { %991 = vmatpush.msrb.mxu0 %v940_v41 }
 0x1a3   :  { %992 = vmatpush.msrb.mxu0 %v939_v46 }
 0x1a5   :  { %993 = vmatpush.msrb.mxu0 %v938_v51 }
 0x1a7   :  { %994 = vmatpush.msrb.mxu0 %v937_v55 }
 0x1a9   :  { %995 = vmatpush.msrb.mxu0 %v936_v58 }
 0x20a   :  { %v804_v63 = vpop.f32.mrf.mxu3 }
 0x20b   :  { %v2102_v1 = vadd.f32 %v804_v63, %v709_v0  ;;  %v935_v63 = vld [vmem:[#allocation13 + $0x48] sm:$0xff] }
 0x20c   :  { %996 = vmatpush.msrb.mxu0 %v935_v63 }
 0x20d   :  { %v816_v5 = vrot.slane %v2102_v1, 2 }
 0x211   :  { %v764_v62 = vpop.f32.mrf.mxu2 }
 0x212   :  { %v2104_v25 = vadd.f32 %v764_v62, %v709_v0  ;;  %v984_v62 = vld [vmem:[#allocation13 + $0x1d0] sm:$0xff] }
 0x213   :  { %1055 = vmatpush.msrb.mxu3 %v984_v62 }
 0x214   :  { %v814_v7 = vrot.slane %v2104_v25, 6 }
 0x21b   :  { %v784_v3 = vpop.f32.mrf.mxu2  ;;  %v744_v6 = vpop.f32.mrf.mxu0 }
 0x21c   :  { %v2106_v4 = vadd.f32 %v784_v3, %v709_v0  ;;  %v2110_v8 = vadd.f32 %v744_v6, %v709_v0  ;;  %v951_v0 = vld [vmem:[#allocation13 + $0xc8] sm:$0xff]  ;;  %v961_v3 = vld [vmem:[#allocation13 + $0x118] sm:$0xff]  ;;  %v934_v6 = vld [vmem:[#allocation13 + $0x40] sm:$0xff] }
 0x21d   :  { %1016 = vmatpush.msra.mxu1 %v951_v0  ;;  %997 = vmatpush.msrb.mxu0 %v934_v6 }
 0x21e   :  { %v815_v9 = vrot.slane %v2106_v4, 4  ;;  %v818_v11 = vsel %vm817_vm13, %v2110_v8, %v814_v7  ;;  %v950_v7 = vld [vmem:[#allocation13 + $0xc0] sm:$0xff] }
 0x21f   :  { %1017 = vmatpush.msra.mxu1 %v950_v7 }
 0x220   :  { %v820_v12 = vsel %vm819_vm6, %v815_v9, %v816_v5  ;;  %v983_v5 = vld [vmem:[#allocation13 + $0x1c8] sm:$0xff]  ;;  %v960_v9 = vld [vmem:[#allocation13 + $0x110] sm:$0xff] }
 0x221   :  { %v821_v13 = vsel %vm133_vm0, %v818_v11, %v820_v12  ;;  %1056 = vmatpush.msrb.mxu3 %v983_v5  ;;  %v982_v11 = vld [vmem:[#allocation13 + $0x1c0] sm:$0xff]  ;;  %v933_v12 = vld [vmem:[#allocation13 + $0x38] sm:$0xff] }
 0x222   :  { %828 = vst [vmem:[#allocation1] ss:$4 sm:$0xff] %v821_v13  ;;  %998 = vmatpush.msrb.mxu0 %v933_v12 }
 0x223   :  { %1057 = vmatpush.msrb.mxu3 %v982_v11 }
 0x224   :  { %999 = vmatpush.msrb.mxu0 %v932_v16 }
 0x225   :  { %1058 = vmatpush.msrb.mxu3 %v981_v15 }
 0x229   :  { %v833_v18 = vld.sshfl [vmem:[#allocation1 + $0x10] sm:$0xff pattern:$0x73625140]  ;;  %v834_v17 = vld.sshfl [vmem:[#allocation1 + $0x18] sm:$0xff pattern:$0x73625140] }
 0x22a   :  { %v1573_v19 = vpack.i.bf16 %v834_v17, %v833_v18  ;;  %v831_v22 = vld.sshfl [vmem:[#allocation1] sm:$0xff pattern:$0x73625140]  ;;  %v832_v21 = vld.sshfl [vmem:[#allocation1 + $0x8] sm:$0xff pattern:$0x73625140] }
 0x22b   :  { %v1578_v24 = vpack.i.bf16 %v831_v22, %v2013_v20  ;;  %862 = vst [vmem:[#allocation1] ss:$4 sm:$0xff] %v821_v13  ;;  %v948_v18 = vld [vmem:[#allocation13 + $0xb0] sm:$0xff]  ;;  %v958_v17 = vld [vmem:[#allocation13 + $0x100] sm:$0xff]  ;;  %v931_v22 = vld [vmem:[#allocation13 + $0x28] sm:$0xff] }
 0x22c   :  { %1574 = vrot.lane.b32.xlu0 %v1573_v19, %s1799_s30  ;;  %v980_v19 = vld [vmem:[#allocation13 + $0x1b0] sm:$0xff]  ;;  %1000 = vmatpush.msrb.mxu0 %v931_v22 }
 0x22d   :  { %1579 = vrot.lane.b32.xlu1 %v1578_v24, %s1799_s30  ;;  %1059 = vmatpush.msrb.mxu3 %v980_v19  ;;  %v979_v24 = vld [vmem:[#allocation13 + $0x1a8] sm:$0xff] }
 0x22f   :  { %1060 = vmatpush.msrb.mxu3 %v979_v24 }
 0x232   :  { %v867_v26 = vld.sshfl [vmem:[#allocation1 + $0x10] sm:$0xff pattern:$0x73625140]  ;;  %v868_v27 = vld.sshfl [vmem:[#allocation1 + $0x18] sm:$0xff pattern:$0x73625140] }
 0x233   :  { %v1583_v28 = vpack.i.bf16 %v868_v27, %v867_v26  ;;  %v865_v29 = vld.sshfl [vmem:[#allocation1] sm:$0xff pattern:$0x73625140]  ;;  %v866_v30 = vld.sshfl [vmem:[#allocation1 + $0x8] sm:$0xff pattern:$0x73625140] }
 0x234   :  { %838 = vrot.lane.b32.xlu0 %v832_v21, %s1799_s30  ;;  %v1588_v31 = vpack.i.bf16 %v865_v29, %v2016_v23  ;;  %896 = vst [vmem:[#allocation1] ss:$4 sm:$0xff] %v821_v13  ;;  %v970_v23 = vld [vmem:[#allocation13 + $0x160] sm:$0xff]  ;;  %v949_v13 = vld [vmem:[#allocation13 + $0xb8] sm:$0xff]  ;;  %v947_v21 = vld [vmem:[#allocation13 + $0xa8] sm:$0xff] }
 0x235   :  { %1584 = vrot.lane.b32.xlu2 %v1583_v28, %s1801_s3  ;;  %1033 = vmatpush.msra.mxu2 %v970_v23  ;;  %v930_v26 = vld [vmem:[#allocation13 + $0x20] sm:$0xff]  ;;  %v929_v29 = vld [vmem:[#allocation13 + $0x18] sm:$0xff] }
 0x236   :  { %1589 = vrot.lane.b32.xlu1 %v1588_v31, %s1801_s3  ;;  %1018 = vmatpush.msra.mxu1 %v949_v13  ;;  %v946_v27 = vld [vmem:[#allocation13 + $0xa0] sm:$0xff]  ;;  %v977_v31 = vld [vmem:[#allocation13 + $0x198] sm:$0xff] }
 0x237   :  { %1034 = vmatpush.msra.mxu2 %v969_v37  ;;  %v978_v28 = vld [vmem:[#allocation13 + $0x1a0] sm:$0xff]  ;;  %1001 = vmatpush.msrb.mxu0 %v930_v26 }
 0x238   :  { %1019 = vmatpush.msra.mxu1 %v948_v18  ;;  %1061 = vmatpush.msrb.mxu3 %v978_v28  ;;  %v942_v23 = vld [vmem:[#allocation13 + $0x80] sm:$0xff] }
 0x239   :  { %1035 = vmatpush.msra.mxu2 %v968_v38  ;;  %1002 = vmatpush.msrb.mxu0 %v929_v29 }
 0x23a   :  { %1020 = vmatpush.msra.mxu1 %v947_v21  ;;  %1062 = vmatpush.msrb.mxu3 %v977_v31  ;;  %v2151_v31 = vld [vmem:[%s2251_s4] ss:$0 sm:$0xff] }
 0x23b   :  { %v901_v20 = vld.sshfl [vmem:[#allocation1 + $0x10] sm:$0xff pattern:$0x73625140]  ;;  %v902_v32 = vld.sshfl [vmem:[#allocation1 + $0x18] sm:$0xff pattern:$0x73625140]  ;;  %1036 = vmatpush.msra.mxu2 %v967_v40 }
 0x23c   :  { %872 = vrot.lane.b32.xlu0 %v866_v30, %s1801_s3  ;;  %v1593_v33 = vpack.i.bf16 %v902_v32, %v901_v20  ;;  %v899_v61 = vld.sshfl [vmem:[#allocation1] sm:$0xff pattern:$0x73625140]  ;;  %v900_v36 = vld.sshfl [vmem:[#allocation1 + $0x8] sm:$0xff pattern:$0x73625140]  ;;  %1021 = vmatpush.msra.mxu1 %v946_v27 }
 0x23d   :  { %v1598_v35 = vpack.i.bf16 %v899_v61, %v903_v34  ;;  %1037 = vmatpush.msra.mxu2 %v966_v43  ;;  %v945_v30 = vld [vmem:[#allocation13 + $0x98] sm:$0xff]  ;;  %v928_v20 = vld [vmem:[#allocation13 + $0x10] sm:$0xff]  ;;  %v927_v61 = vld [vmem:[#allocation13 + $0x8] sm:$0xff] }
 0x23e   :  { %1594 = vrot.lane.b32.xlu2 %v1593_v33, %s1803_s14  ;;  %1022 = vmatpush.msra.mxu1 %v945_v30  ;;  %v944_v32 = vld [vmem:[#allocation13 + $0x90] sm:$0xff]  ;;  %v943_v34 = vld [vmem:[#allocation13 + $0x88] sm:$0xff] }
 0x23f   :  { %1599 = vrot.lane.b32.xlu1 %v1598_v35, %s1803_s14  ;;  %1038 = vmatpush.msra.mxu2 %v965_v48  ;;  %v976_v33 = vld [vmem:[#allocation13 + $0x190] sm:$0xff]  ;;  %v975_v35 = vld [vmem:[#allocation13 + $0x188] sm:$0xff] }
 0x240   :  { %1003 = vmatpush.msrb.mxu0 %v928_v20  ;;  %1023 = vmatpush.msra.mxu1 %v944_v32  ;;  %v2146_v30 = vld [vmem:[%s2251_s4 + $0x1] ss:$0 sm:$0xff]  ;;  %s1808_s4 = smov 20  }
 0x241   :  { %1039 = vmatpush.msra.mxu2 %v964_v53  ;;  %1063 = vmatpush.msrb.mxu3 %v976_v33 }
 0x242   :  { %1004 = vmatpush.msrb.mxu0 %v927_v61  ;;  %1024 = vmatpush.msra.mxu1 %v943_v34 }
 0x243   :  { %1040 = vmatpush.msra.mxu2 %v963_v45  ;;  %1064 = vmatpush.msrb.mxu3 %v975_v35 }
 0x244   :  { %1025 = vmatpush.msra.mxu1 %v942_v23 }
 0x245   :  { %1041 = vmatpush.msra.mxu2 %v962_v60  ;;  %1065 = vmatpush.msrb.mxu3 %v974_v10 }
 0x246   :  { %906 = vrot.lane.b32.xlu2 %v900_v36, %s1803_s14  ;;  %v926_v36 = vld [vmem:[#allocation13] sm:$0xff] }
 0x247   :  { %1042 = vmatpush.msra.mxu2 %v961_v3  ;;  %1005 = vmatpush.msrb.mxu0 %v926_v36 }
 0x249   :  { %1043 = vmatpush.msra.mxu2 %v960_v9 }
 0x24b   :  { %1044 = vmatpush.msra.mxu2 %v959_v14 }
 0x24d   :  { %1045 = vmatpush.msra.mxu2 %v958_v17 }
 0x28f   :  { %v1585_v37 = vpop.permute.xlu2 %1584 }
 0x290   :  { %v1587_v39 = vunpack.i.h.bf16 %v1585_v37  ;;  %v1586_v40 = vunpack.i.l.bf16 %v1585_v37 }
 0x292   :  { %v882_v49 = vsel %vm2259_vm15, %v1586_v40, %v1587_v39 }
 0x298   :  { %v1595_v38 = vpop.permute.xlu2 %1594 }
 0x299   :  { %v1597_v44 = vunpack.i.h.bf16 %v1595_v38  ;;  %v1596_v46 = vunpack.i.l.bf16 %v1595_v38 }
 0x29b   :  { %v916_v52 = vsel %vm405_vm3, %v1596_v46, %v1597_v44 }
 0x29e   :  { %v1575_v50 = vpop.permute.xlu0 %1574 }
 0x29f   :  { %v1577_v41 = vunpack.i.h.bf16 %v1575_v50  ;;  %v1576_v42 = vunpack.i.l.bf16 %v1575_v50  ;;  %v1580_v43 = vpop.permute.xlu1 %1579 }
 0x2a0   :  { %v1582_v56 = vunpack.i.h.bf16 %v1580_v43  ;;  %v1581_v45 = vunpack.i.l.bf16 %v1580_v43 }
 0x2a1   :  { %v848_v47 = vsel %vm233_vm1, %v1576_v42, %v1577_v41 }
 0x2a2   :  { %v856_v48 = vmax.f32 %v2106_v4, %v848_v47  ;;  %v849_v62 = vsel %vm233_vm1, %v1577_v41, %v1581_v45  ;;  %v907_v4 = vpop.permute.xlu2 %906 }
 0x2a3   :  { %v857_v11 = vmax.f32 %v2102_v1, %v849_v62  ;;  %v915_v12 = vsel %vm405_vm3, %v907_v4, %v1596_v46 }
 0x2a4   :  { %v890_v51 = vmax.f32 %v856_v48, %v882_v49  ;;  %v1607_v48 = vld [vmem:[#allocation14 + $0x5] ss:$0 sm:$0xff] }
 0x2a6   :  { %v839_v53 = vpop.permute.xlu0 %838  ;;  %v924_v54 = vmax.f32 %v890_v51, %v916_v52 }
 0x2a7   :  { %v847_v57 = vsel %vm233_vm1, %v839_v53, %v1576_v42  ;;  %v846_v58 = vsel %vm233_vm1, %v1582_v56, %v839_v53  ;;  %v1608_v56 = vld [vmem:[#allocation14 + $0x8] ss:$0 sm:$0xff] }
 0x2a8   :  { %v1590_v55 = vpop.permute.xlu1 %1589  ;;  %1046 = vmatmul.f32.vlgmr.msra.gmra.mxu2 %v924_v54  ;;  %v855_v63 = vmax.f32 %v2104_v25, %v847_v57  ;;  %v854_v3 = vmax.f32 %v2110_v8, %v846_v58 }
 0x2a9   :  { %v1591_v59 = vunpack.i.l.bf16 %v1590_v55  ;;  %v1592_v60 = vunpack.i.h.bf16 %v1590_v55 }
 0x2ab   :  { %v883_v7 = vsel %vm2259_vm15, %v1587_v39, %v1591_v59 }
 0x2ac   :  { %v891_v25 = vmax.f32 %v857_v11, %v883_v7 }
 0x2ae   :  { %v873_v0 = vpop.permute.xlu0 %872 }
 0x2af   :  { %v880_v5 = vsel %vm2259_vm15, %v1592_v60, %v873_v0  ;;  %v881_v6 = vsel %vm2259_vm15, %v873_v0, %v1586_v40  ;;  %v1606_v40 = vld [vmem:[#allocation14 + $0x1] ss:$0 sm:$0xff]  ;;  %v1611_v0 = vld [vmem:[#allocation14 + $0x2] ss:$0 sm:$0xff] }
 0x2b0   :  { %v889_v9 = vmax.f32 %v855_v63, %v881_v6  ;;  %v888_v13 = vmax.f32 %v854_v3, %v880_v5 }
 0x2b1   :  { %v1600_v14 = vpop.permute.xlu1 %1599 }
 0x2b2   :  { %v1602_v15 = vunpack.i.h.bf16 %v1600_v14  ;;  %v1601_v16 = vunpack.i.l.bf16 %v1600_v14  ;;  %v923_v18 = vmax.f32 %v889_v9, %v915_v12  ;;  %v1612_v12 = vld [vmem:[#allocation14 + $0x7] ss:$0 sm:$0xff] }
 0x2b4   :  { %v914_v17 = vsel %vm405_vm3, %v1602_v15, %v907_v4  ;;  %1026 = vmatmul.f32.vlgmr.msra.gmra.mxu1 %v923_v18  ;;  %v917_v8 = vsel %vm405_vm3, %v1597_v44, %v1601_v16 }
 0x2b5   :  { %v922_v19 = vmax.f32 %v888_v13, %v914_v17  ;;  %v925_v22 = vmax.f32 %v891_v25, %v917_v8 }
 0x2b7   :  { %1006 = vmatmul.f32.vlgmr.msrb.gmra.mxu0 %v922_v19  ;;  %1066 = vmatmul.f32.vlgmr.msrb.gmra.mxu3 %v925_v22  ;;  %v1609_v22 = vld [vmem:[#allocation14 + $0x3] ss:$0 sm:$0xff] }
 0x32b   :  { %v1047_v26 = vpop.f32.mrf.mxu2 }
 0x331   :  { %v1027_v21 = vpop.f32.mrf.mxu1 }
 0x334   :  { %v1007_v24 = vpop.f32.mrf.mxu0 }
 0x335   :  { %v1028_v1 = vadd.f32 %v1027_v21, %v1007_v24  ;;  %v1610_v21 = vld [vmem:[#allocation14 + $0x6] ss:$0 sm:$0xff] }
 0x337   :  { %v1048_v27 = vadd.f32 %v1047_v26, %v1028_v1 }
 0x33a   :  { %v1067_v28 = vpop.f32.mrf.mxu3 }
 0x33b   :  { %v1068_v29 = vadd.f32 %v1067_v28, %v1048_v27 }
 0x33d   :  { %v2153_v20 = vmax.f32 %v1068_v29, 0.0  ;;  %v1613_v29 = vld [vmem:[#allocation14] ss:$0 sm:$0xff] }
 0x33f   :  { %v1104_v32 = vmul.f32 %v2146_v30, %v2153_v20  ;;  %v1074_v33 = vmul.f32 %v2151_v31, %v2153_v20  ;;  %v1071_v61 = vmul.f32 %v2153_v20, %v2153_v20 }
 0x341   :  { %v1105_v34 = vsel %vm817_vm13, %v1104_v32, 0.0  ;;  %v1075_v35 = vsel %vm817_vm13, %v1074_v33, 0.0  ;;  %v1079_v36 = vmul.f32 %v2151_v31, %v1071_v61  ;;  %v1109_v37 = vmul.f32 %v2146_v30, %v1071_v61 }
 0x342   :  { %1106 = vadd.xlane.f32.xlu1 %v1105_v34  ;;  %1076 = vadd.xlane.f32.xlu0 %v1075_v35 }
 0x343   :  { %v1080_v23 = vsel %vm817_vm13, %v1079_v36, 0.0  ;;  %v1110_v10 = vsel %vm817_vm13, %v1109_v37, 0.0 }
 0x344   :  { %1081 = vadd.xlane.f32.xlu2 %v1080_v23 }
 0x34c   :  { %1111 = vadd.xlane.f32.xlu2 %v1110_v10 }
 0x35b   :  { %1156 = vrot.lane.b32.xlu1 %v1606_v40, %s1792_s10 }
 0x363   :  { %1233 = vrot.lane.b32.xlu1 %v1607_v48, %s1808_s4 }
 0x364   :  { %1177 = vrot.lane.b32.xlu2 %v1611_v0, %s1810_s23 }
 0x36b   :  { %1298 = vrot.lane.b32.xlu1 %v1608_v56, %s1809_s0 }
 0x36c   :  { %1277 = vrot.lane.b32.xlu2 %v1612_v12, %s1797_s29 }
 0x3b5   :  { %v1077_v38 = vpop.xlane.xlu0 %1076  ;;  %v1107_v42 = vpop.xlane.xlu1 %1106 }
 0x3b6   :  { %v1078_v50 = vmul.f32 0.015625, %v1077_v38  ;;  %v1108_v46 = vmul.f32 0.015625, %v1107_v42 }
 0x3b7   :  { %v1082_v39 = vpop.xlane.xlu2 %1081 }
 0x3b8   :  { %v1084_v41 = vmul.f32 %v1078_v50, %v1078_v50  ;;  %v1083_v43 = vmul.f32 0.015625, %v1082_v39  ;;  %v1114_v52 = vmul.f32 %v1108_v46, %v1108_v46  ;;  %v1117_v7 = vmul.f32 %v2146_v30, %v1108_v46 }
 0x3b9   :  { %v1087_v9 = vmul.f32 %v2151_v31, %v1078_v50 }
 0x3ba   :  { %v1085_v44 = vsub.f32 %v1083_v43, %v1084_v41 }
 0x3bb   :  { %v1118_v15 = vadd.f32 %v1117_v7, %v1087_v9 }
 0x3bc   :  { %v1086_v47 = vmax.f32 %v1085_v44, 0.0 }
 0x3bd   :  { %v1132_v8 = vsub.f32 %v2153_v20, %v1118_v15 }
 0x3be   :  { %v1089_v49 = vadd.f32 1e-05, %v1086_v47 }
 0x3bf   :  { %v1112_v51 = vpop.xlane.xlu2 %1111 }
 0x3c0   :  { %v1113_v53 = vmul.f32 0.015625, %v1112_v51  ;;  %1614 = vrsqrt.f32 %v1089_v49  ;;  %vm1096_vm1 = vweird.f32 %v1089_v49 }
 0x3c2   :  { %v1115_v54 = vsub.f32 %v1113_v53, %v1114_v52 }
 0x3c4   :  { %v1116_v55 = vmax.f32 %v1115_v54, 0.0 }
 0x3c6   :  { %v1119_v45 = vadd.f32 1e-05, %v1116_v55  ;;  %v1615_v57 = vpop.eup %1614 }
 0x3c7   :  { %v1091_v58 = vmul.f32 %v1615_v57, %v1089_v49  ;;  %vm1097_vm0 = vweird.f32 %v1615_v57  ;;  %v1178_v32 = vpop.permute.xlu2 %1177 }
 0x3c8   :  { %1616 = vrsqrt.f32 %v1119_v45  ;;  %vm1098_vm6 = vmor %vm1096_vm1, %vm1097_vm0  ;;  %vm1126_vm15 = vweird.f32 %v1119_v45  ;;  %vm1143_vm0 = vcmask 1041552   ;;  %vm1144_vm1 = vcmask 142338  }
 0x3c9   :  { %v1092_v59 = vmul.f32 %v1615_v57, %v1091_v58  ;;  %v1179_v33 = vrot.slane %v1178_v32, 6 }
 0x3cb   :  { %v1093_v60 = vmul.f32 0.5, %v1092_v59 }
 0x3cd   :  { %v1094_v4 = vsub.f32 1.5, %v1093_v60  ;;  %v1157_v27 = vpop.permute.xlu1 %1156 }
 0x3ce   :  { %v1617_v62 = vpop.eup %1616  ;;  %v1158_v28 = vrot.slane %v1157_v27, 6 }
 0x3cf   :  { %v1121_v63 = vmul.f32 %v1617_v62, %v1119_v45  ;;  %v1095_v5 = vmul.f32 %v1615_v57, %v1094_v4  ;;  %vm1127_vm3 = vweird.f32 %v1617_v62  ;;  %v1278_v45 = vpop.permute.xlu2 %1277 }
 0x3d0   :  { %vm1128_vm5 = vmor %vm1126_vm15, %vm1127_vm3  ;;  %vm1134_vm15 = vcmask 289794   ;;  %v1279_v59 = vrot.slane %v1278_v45, 6 }
 0x3d1   :  { %v1122_v3 = vmul.f32 %v1617_v62, %v1121_v63  ;;  %v1099_v14 = vsel %vm1098_vm6, %v1615_v57, %v1095_v5  ;;  %vm1145_vm3 = vmor %vm1144_vm1, %vm1143_vm0  ;;  %vm1180_vm6 = vcmask 31744  }
 0x3d2   :  { %v1100_v18 = vmul.f32 %v2151_v31, %v1099_v14  ;;  %v1181_v35 = vsel %vm1180_vm6, %v1179_v33, %v1178_v32 }
 0x3d3   :  { %v1123_v6 = vmul.f32 0.5, %v1122_v3  ;;  %v1280_v3 = vsel %vm638_vm14, %v1279_v59, %v1278_v45  ;;  %vm2261_vm14 = vcmask 769024   ;;  %v1430_v59 = vld [vmem:[#allocation16 + $0x70] sm:$0xff] }
 0x3d5   :  { %v1124_v11 = vsub.f32 1.5, %v1123_v6  ;;  %v1234_v43 = vpop.permute.xlu1 %1233 }
 0x3d6   :  { %v1235_v44 = vrot.slane %v1234_v43, 6 }
 0x3d7   :  { %v1125_v13 = vmul.f32 %v1617_v62, %v1124_v11 }
 0x3d9   :  { %v1129_v16 = vsel %vm1128_vm5, %v1617_v62, %v1125_v13  ;;  %vm1135_vm5 = vmor %vm1134_vm15, %vm817_vm13 }
 0x3da   :  { %v1130_v25 = vmul.f32 %v2146_v30, %v1129_v16  ;;  %1136 = vst.msk [vmem:[#allocation5] sm:$0xf] %vm1135_vm5, %v1798_v2  ;;  %v1159_v30 = vsel %vm266_vm9, %v1158_v28, %v1157_v27  ;;  %vm1236_vm9 = vcmask 162816  }
 0x3db   :  { %v1237_v49 = vsel %vm1236_vm9, %v1235_v44, %v1234_v43 }
 0x3dc   :  { %v1131_v17 = vadd.f32 %v1130_v25, %v1100_v18  ;;  %v1320_v25 = vld [vmem:[#allocation7] sm:$0x1] }
 0x3dd   :  { %v1299_v63 = vpop.permute.xlu1 %1298 }
 0x3de   :  { %v1133_v19 = vmul.f32 %v1132_v8, %v1131_v17  ;;  %v1300_v5 = vrot.slane %v1299_v63, 6 }
 0x3e0   :  { %1138 = vrot.lane.b32.xlu0 %v1133_v19, %s1795_s7  ;;  %v1301_v12 = vsel %vm711_vm8, %v1300_v5, %v1299_v63  ;;  %v1426_v63 = vld [vmem:[#allocation16 + $0x50] sm:$0xff]  ;;  %v1423_v5 = vld [vmem:[#allocation16 + $0x38] sm:$0xff] }
 0x3e8   :  { %1200 = vrot.lane.b32.xlu0 %v1609_v22, %s1794_s27 }
 0x3f0   :  { %1256 = vrot.lane.b32.xlu0 %v1610_v21, %s1784_s25  ;;  %s1811_s25 = smov 124  }
 0x452   :  { %v1139_v24 = vpop.permute.xlu0 %1138 }
 0x453   :  { %v1140_v1 = vrot.slane %v1139_v24, 6 }
 0x455   :  { %v1141_v26 = vsel %vm438_vm11, %v1140_v1, %v1139_v24 }
 0x456   :  { %1146 = vst.msk [vmem:[#allocation5] sm:$0xf] %vm1145_vm3, %v1141_v26 }
 0x45a   :  { %v1201_v36 = vpop.permute.xlu0 %1200 }
 0x45b   :  { %v1202_v37 = vrot.slane %v1201_v36, 6 }
 0x45d   :  { %v1152_v31 = vld [vmem:[#allocation5] sm:$0xf]  ;;  %v1203_v39 = vsel %vm332_vm10, %v1202_v37, %v1201_v36  ;;  %vm1248_vm10 = vcmask 883712  }
 0x45e   :  { %v1161_v20 = vmul.f32 %v1159_v30, %v1152_v31  ;;  %v1147_v61 = vld [vmem:[#allocation5] sm:$0x3] }
 0x45f   :  { %v1150_v2 = vmul.f32 %v1613_v29, %v1147_v61  ;;  %v1173_v34 = vld [vmem:[#allocation5] sm:$0xf] }
 0x460   :  { %1163 = vst [vmem:[#allocation1] ss:$4 sm:$0xff] %v1161_v20  ;;  %v1183_v23 = vmul.f32 %v1181_v35, %v1173_v34  ;;  %v1196_v50 = vld [vmem:[#allocation5] sm:$0xf] }
 0x461   :  { %1151 = vst [vmem:[#allocation6] sm:$0x3] %v1150_v2  ;;  %v1205_v40 = vmul.f32 %v1203_v39, %v1196_v50  ;;  %v1217_v46 = vld [vmem:[#allocation5] sm:$0xf]  ;;  %v1316_v39 = vld [vmem:[%s2253_s6] sm:$0x1] }
 0x462   :  { %v1229_v51 = vld [vmem:[#allocation5] sm:$0xf]  ;;  %v1257_v52 = vpop.permute.xlu0 %1256  ;;  %s1814_s6 = smov [#allocation17]  }
 0x463   :  { %v1239_v53 = vmul.f32 %v1237_v49, %v1229_v51  ;;  %v1258_v54 = vrot.slane %v1257_v52, 6  ;;  %v1252_v58 = vld [vmem:[#allocation5] sm:$0xf] }
 0x464   :  { %v1273_v0 = vld [vmem:[#allocation5] sm:$0xf] }
 0x465   :  { %v1259_v57 = vsel %vm505_vm12, %v1258_v54, %v1257_v52  ;;  %v1282_v6 = vmul.f32 %v1280_v3, %v1273_v0  ;;  %v1294_v11 = vld [vmem:[#allocation5] sm:$0xf]  ;;  %vm1192_vm12 = vcmask 1014784   ;;  %v1425_v0 = vld [vmem:[#allocation16 + $0x48] sm:$0xff] }
 0x466   :  { %v1261_v60 = vmul.f32 %v1259_v57, %v1252_v58  ;;  %v1303_v13 = vmul.f32 %v1301_v12, %v1294_v11  ;;  %v1431_v58 = vld [vmem:[#allocation16 + $0x78] sm:$0xff]  ;;  %v1424_v3 = vld [vmem:[#allocation16 + $0x40] sm:$0xff] }
 0x467   :  { %v1165_v10 = vld.sshfl [vmem:[#allocation1 + $0x8] sm:$0xff pattern:$0x73625140]  ;;  %v1164_v38 = vld.sshfl [vmem:[#allocation1] sm:$0xff pattern:$0x73625140]  ;;  %1432 = vmatpush.msrb.mxu1 %v1431_v58 }
 0x468   :  { %1168 = vrot.lane.b32.xlu1 %v1165_v10, %s1800_s12  ;;  %1166 = vrot.lane.b32.xlu2 %v1164_v38, %s1800_s12  ;;  %1185 = vst [vmem:[#allocation1] ss:$4 sm:$0xff] %v1183_v23  ;;  %v1420_v11 = vld [vmem:[#allocation16 + $0x20] sm:$0xff]  ;;  %v1419_v12 = vld [vmem:[#allocation16 + $0x18] sm:$0xff] }
 0x469   :  { %1433 = vmatpush.msrb.mxu1 %v1430_v59 }
 0x46f   :  { %v1186_v41 = vld.sshfl [vmem:[#allocation1] sm:$0xff pattern:$0x73625140]  ;;  %v1187_v42 = vld.sshfl [vmem:[#allocation1 + $0x8] sm:$0xff pattern:$0x73625140] }
 0x470   :  { %1188 = vrot.lane.b32.xlu0 %v1186_v41, %s1811_s25  ;;  %1207 = vst [vmem:[#allocation1] ss:$4 sm:$0xff] %v1205_v40 }
 0x477   :  { %v1208_v47 = vld.sshfl [vmem:[#allocation1] sm:$0xff pattern:$0x73625140]  ;;  %v1209_v48 = vld.sshfl [vmem:[#allocation1 + $0x8] sm:$0xff pattern:$0x73625140] }
 0x478   :  { %1219 = vst [vmem:[#allocation1] ss:$4 sm:$0xff] %v1217_v46  ;;  %v2210_v46 = vld [vmem:[%s2256_s9 + $0x1] sm:$0x1] }
 0x479   :  { %vm1481_vm1 = vcmp.gt.f32.partialorder %v2210_v46, 0.0 }
 0x47f   :  { %v1221_v55 = vld.sshfl [vmem:[#allocation1 + $0x8] sm:$0xff pattern:$0x73625140]  ;;  %v1220_v56 = vld.sshfl [vmem:[#allocation1] sm:$0xff pattern:$0x73625140] }
 0x480   :  { %1224 = vrot.lane.b32.xlu0 %v1221_v55, %s1802_s13  ;;  %1222 = vrot.lane.b32.xlu1 %v1220_v56, %s1802_s13  ;;  %1241 = vst [vmem:[#allocation1] ss:$4 sm:$0xff] %v1239_v53 }
 0x487   :  { %v1243_v62 = vld.sshfl [vmem:[#allocation1 + $0x8] sm:$0xff pattern:$0x73625140]  ;;  %v1242_v4 = vld.sshfl [vmem:[#allocation1] sm:$0xff pattern:$0x73625140] }
 0x488   :  { %1246 = vrot.lane.b32.xlu1 %v1243_v62, %s1812_s24  ;;  %1244 = vrot.lane.b32.xlu2 %v1242_v4, %s1812_s24  ;;  %1263 = vst [vmem:[#allocation1] ss:$4 sm:$0xff] %v1261_v60  ;;  %v1429_v60 = vld [vmem:[#allocation16 + $0x68] sm:$0xff]  ;;  %v1428_v62 = vld [vmem:[#allocation16 + $0x60] sm:$0xff]  ;;  %v1427_v4 = vld [vmem:[#allocation16 + $0x58] sm:$0xff] }
 0x489   :  { %1434 = vmatpush.msrb.mxu1 %v1429_v60 }
 0x48b   :  { %1435 = vmatpush.msrb.mxu1 %v1428_v62 }
 0x48d   :  { %1436 = vmatpush.msrb.mxu1 %v1427_v4 }
 0x48f   :  { %v1265_v7 = vld.sshfl [vmem:[#allocation1 + $0x8] sm:$0xff pattern:$0x73625140]  ;;  %v1264_v9 = vld.sshfl [vmem:[#allocation1] sm:$0xff pattern:$0x73625140]  ;;  %1437 = vmatpush.msrb.mxu1 %v1426_v63 }
 0x490   :  { %1268 = vrot.lane.b32.xlu2 %v1265_v7, %s1804_s15  ;;  %1266 = vrot.lane.b32.xlu0 %v1264_v9, %s1804_s15  ;;  %1284 = vst [vmem:[#allocation1] ss:$4 sm:$0xff] %v1282_v6  ;;  %v1422_v6 = vld [vmem:[#allocation16 + $0x30] sm:$0xff]  ;;  %v1421_v7 = vld [vmem:[#allocation16 + $0x28] sm:$0xff] }
 0x491   :  { %1438 = vmatpush.msrb.mxu1 %v1425_v0 }
 0x493   :  { %1439 = vmatpush.msrb.mxu1 %v1424_v3 }
 0x495   :  { %1440 = vmatpush.msrb.mxu1 %v1423_v5 }
 0x497   :  { %v1286_v14 = vld.sshfl [vmem:[#allocation1 + $0x8] sm:$0xff pattern:$0x73625140]  ;;  %v1285_v15 = vld.sshfl [vmem:[#allocation1] sm:$0xff pattern:$0x73625140]  ;;  %1441 = vmatpush.msrb.mxu1 %v1422_v6 }
 0x498   :  { %1289 = vrot.lane.b32.xlu0 %v1286_v14, %s1806_s17  ;;  %1287 = vrot.lane.b32.xlu1 %v1285_v15, %s1806_s17  ;;  %1305 = vst [vmem:[#allocation1] ss:$4 sm:$0xff] %v1303_v13 }
 0x499   :  { %1442 = vmatpush.msrb.mxu1 %v1421_v7 }
 0x49b   :  { %1443 = vmatpush.msrb.mxu1 %v1420_v11 }
 0x49d   :  { %1444 = vmatpush.msrb.mxu1 %v1419_v12 }
 0x49f   :  { %v1307_v16 = vld.sshfl [vmem:[#allocation1 + $0x8] sm:$0xff pattern:$0x73625140]  ;;  %v1306_v18 = vld.sshfl [vmem:[#allocation1] sm:$0xff pattern:$0x73625140] }
 0x4a0   :  { %1210 = vrot.lane.b32.xlu1 %v1208_v47, %s1801_s3  ;;  %1310 = vrot.lane.b32.xlu2 %v1307_v16, %s1813_s5  ;;  %v2215_v47 = vld [vmem:[%s2256_s9] sm:$0x1]  ;;  %v1418_v16 = vld [vmem:[#allocation16 + $0x10] sm:$0xff]  ;;  %s1515_s9 = sshll.u32 %s1814_s6, 4  ;;  %s1516_s9 = int_to_ptr.vmem [resolvable:$true] %s1515_s9 }
 0x4a1   :  { %1308 = vrot.lane.b32.xlu0 %v1306_v18, %s1813_s5  ;;  %1445 = vmatpush.msrb.mxu1 %v1418_v16  ;;  %vm1453_vm3 = vcmp.gt.f32.partialorder %v2215_v47, 0.0 }
 0x4a8   :  { %1190 = vrot.lane.b32.xlu2 %v1187_v42, %s1811_s25 }
 0x4a9   :  { %1212 = vrot.lane.b32.xlu0 %v1209_v48, %s1801_s3  ;;  %s1517_s3 = sshll.u32 %s2258_s11, 4  ;;  %s1518_s3 = int_to_ptr.hbm [resolvable:$true] %s1517_s3 }
 0x4b0   :  { %1323 = vperm.xlu2 %1572, %v1320_v25  }
 0x4c2   :  { %v1167_v17 = vpop.permute.xlu2 %1166 }
 0x4da   :  { %v1169_v8 = vpop.permute.xlu1 %1168 }
 0x4db   :  { %v1170_v19 = vsel %vm299_vm2, %v1167_v17, %v1169_v8  ;;  %vm1312_vm2 = vcmask 752640   ;;  %v1417_v17 = vld [vmem:[#allocation16 + $0x8] sm:$0xff] }
 0x4dc   :  { %1172 = vst [vmem:[#allocation6 + $0x2] sm:$0x3] %v1170_v19  ;;  %1446 = vmatpush.msrb.mxu1 %v1417_v17 }
 0x4e2   :  { %v1245_v22 = vpop.permute.xlu2 %1244  ;;  %v1189_v21 = vpop.permute.xlu0 %1188 }
 0x4ea   :  { %v1269_v24 = vpop.permute.xlu2 %1268 }
 0x4f2   :  { %v1225_v1 = vpop.permute.xlu0 %1224  ;;  %v1223_v26 = vpop.permute.xlu1 %1222 }
 0x4f3   :  { %v1226_v27 = vsel %vm472_vm4, %v1223_v26, %v1225_v1  ;;  %vm2262_vm4 = vcmask 916480  }
 0x4f4   :  { %1228 = vst [vmem:[#allocation6 + $0x8] sm:$0x3] %v1226_v27 }
 0x4fa   :  { %v1247_v28 = vpop.permute.xlu1 %1246  ;;  %v1311_v29 = vpop.permute.xlu2 %1310 }
 0x4fb   :  { %v1249_v30 = vsel %vm1248_vm10, %v1245_v22, %v1247_v28  ;;  %v1416_v22 = vld [vmem:[#allocation16] sm:$0xff] }
 0x4fc   :  { %1251 = vst [vmem:[#allocation6 + $0xa] sm:$0x3] %v1249_v30  ;;  %1447 = vmatpush.msrb.mxu1 %v1416_v22 }
 0x502   :  { %v1267_v31 = vpop.permute.xlu0 %1266  ;;  %v1191_v20 = vpop.permute.xlu2 %1190 }
 0x503   :  { %v1270_v32 = vsel %vm538_vm7, %v1267_v31, %v1269_v24  ;;  %v1193_v33 = vsel %vm1192_vm12, %v1189_v21, %v1191_v20  ;;  %vm1357_vm7 = vcmask 1040384  }
 0x504   :  { %1272 = vst [vmem:[#allocation6 + $0xc] sm:$0x3] %v1270_v32 }
 0x505   :  { %1195 = vst [vmem:[#allocation6 + $0x4] sm:$0x3] %v1193_v33 }
 0x50a   :  { %v1290_v61 = vpop.permute.xlu0 %1289  ;;  %v1288_v2 = vpop.permute.xlu1 %1287 }
 0x50b   :  { %v1291_v34 = vsel %vm2261_vm14, %v1288_v2, %v1290_v61  ;;  %v1324_v41 = vpop.permute.xlu2 %1323 }
 0x50c   :  { %1293 = vst [vmem:[#allocation6 + $0xe] sm:$0x3] %v1291_v34  ;;  %v1326_v42 = vperm.slane %v1324_v41, 0 }
 0x512   :  { %v1211_v23 = vpop.permute.xlu1 %1210 }
 0x513   :  { %v1309_v35 = vpop.permute.xlu0 %1308  ;;  %v1318_v50 = vld [vmem:[#allocation6 + $0x8] sm:$0xff] }
 0x514   :  { %v1313_v36 = vsel %vm1312_vm2, %v1309_v35, %v1311_v29 }
 0x515   :  { %1315 = vst [vmem:[#allocation6 + $0x10] sm:$0x3] %v1313_v36 }
 0x51b   :  { %v1213_v37 = vpop.permute.xlu0 %1212 }
 0x51c   :  { %v1214_v10 = vsel %vm2262_vm4, %v1211_v23, %v1213_v37  ;;  %v1319_v38 = vld [vmem:[#allocation6 + $0x10] sm:$0x3] }
 0x51d   :  { %1216 = vst [vmem:[#allocation6 + $0x6] sm:$0x3] %v1214_v10  ;;  %1537 = vmatpush.msk.msra.mxu0 %vm817_vm13, %v1319_v38 }
 0x51f   :  { %1347 = vmatpush.msra.mxu0 %v1318_v50 }
 0x524   :  { %v1317_v40 = vld [vmem:[#allocation6] sm:$0xff] }
 0x525   :  { %1348 = vmatpush.msra.mxu0 %v1317_v40 }
 0x526   :  { %1538 = vmatmul.msk.f32.vlgmr.msra.gmra.mxu0 %vm438_vm11, %v1316_v39 }
 0x5a3   :  { %v1350_v43 = vpop.f32.mrf.mxu0 }
 0x5a4   :  { %v1351_v44 = vadd.f32 %v1350_v43, %v1326_v42 }
 0x5a6   :  { %v2217_v48 = vmax.f32 %v1351_v44, 0.0 }
 0x5a8   :  { %v1386_v49 = vmul.f32 %v2210_v46, %v2217_v48  ;;  %v1356_v51 = vmul.f32 %v2215_v47, %v2217_v48  ;;  %v1354_v52 = vmul.f32 %v2217_v48, %v2217_v48 }
 0x5aa   :  { %v1387_v53 = vsel %vm1357_vm7, %v1386_v49, 0.0  ;;  %v1358_v54 = vsel %vm1357_vm7, %v1356_v51, 0.0  ;;  %v1362_v55 = vmul.f32 %v2215_v47, %v1354_v52  ;;  %v1391_v45 = vmul.f32 %v2210_v46, %v1354_v52 }
 0x5ab   :  { %1388 = vadd.xlane.f32.xlu0 %v1387_v53  ;;  %1359 = vadd.xlane.f32.xlu1 %v1358_v54 }
 0x5ac   :  { %v1363_v56 = vsel %vm1357_vm7, %v1362_v55, 0.0  ;;  %v1392_v57 = vsel %vm1357_vm7, %v1391_v45, 0.0 }
 0x5ad   :  { %1364 = vadd.xlane.f32.xlu2 %v1363_v56 }
 0x5b3   :  { %1393 = vadd.xlane.f32.xlu1 %v1392_v57 }
 0x61e   :  { %v1360_v9 = vpop.xlane.xlu1 %1359  ;;  %v1389_v14 = vpop.xlane.xlu0 %1388 }
 0x61f   :  { %v1361_v13 = vmul.f32 0.015625, %v1360_v9  ;;  %v1390_v8 = vmul.f32 0.015625, %v1389_v14 }
 0x620   :  { %v1365_v15 = vpop.xlane.xlu2 %1364 }
 0x621   :  { %v1367_v18 = vmul.f32 %v1361_v13, %v1361_v13  ;;  %v1366_v25 = vmul.f32 0.015625, %v1365_v15  ;;  %v1396_v1 = vmul.f32 %v1390_v8, %v1390_v8  ;;  %v1399_v37 = vmul.f32 %v1390_v8, %v2210_v46 }
 0x622   :  { %v1370_v10 = vmul.f32 %v1361_v13, %v2215_v47 }
 0x623   :  { %v1368_v19 = vsub.f32 %v1366_v25, %v1367_v18 }
 0x624   :  { %v1400_v40 = vadd.f32 %v1399_v37, %v1370_v10 }
 0x625   :  { %v1369_v21 = vmax.f32 %v1368_v19, 0.0 }
 0x626   :  { %v1394_v24 = vpop.xlane.xlu1 %1393  ;;  %v1414_v49 = vsub.f32 %v2217_v48, %v1400_v40 }
 0x627   :  { %v1395_v26 = vmul.f32 0.015625, %v1394_v24  ;;  %v1372_v27 = vadd.f32 1e-05, %v1369_v21 }
 0x629   :  { %v1397_v28 = vsub.f32 %v1395_v26, %v1396_v1  ;;  %1618 = vrsqrt.f32 %v1372_v27  ;;  %vm1379_vm8 = vweird.f32 %v1372_v27 }
 0x62b   :  { %v1398_v29 = vmax.f32 %v1397_v28, 0.0 }
 0x62d   :  { %v1401_v30 = vadd.f32 1e-05, %v1398_v29 }
 0x62f   :  { %1620 = vrsqrt.f32 %v1401_v30  ;;  %v1619_v31 = vpop.eup %1618  ;;  %vm1408_vm5 = vweird.f32 %v1401_v30 }
 0x630   :  { %v1374_v20 = vmul.f32 %v1619_v31, %v1372_v27  ;;  %vm1380_vm11 = vweird.f32 %v1619_v31 }
 0x631   :  { %vm1381_vm15 = vmor %vm1379_vm8, %vm1380_vm11 }
 0x632   :  { %v1375_v32 = vmul.f32 %v1619_v31, %v1374_v20 }
 0x634   :  { %v1376_v61 = vmul.f32 0.5, %v1375_v32 }
 0x635   :  { %v1621_v33 = vpop.eup %1620 }
 0x636   :  { %v1403_v2 = vmul.f32 %v1621_v33, %v1401_v30  ;;  %v1377_v34 = vsub.f32 1.5, %v1376_v61  ;;  %vm1409_vm13 = vweird.f32 %v1621_v33 }
 0x637   :  { %vm1410_vm0 = vmor %vm1408_vm5, %vm1409_vm13 }
 0x638   :  { %v1404_v35 = vmul.f32 %v1621_v33, %v1403_v2  ;;  %v1378_v36 = vmul.f32 %v1619_v31, %v1377_v34 }
 0x63a   :  { %v1405_v23 = vmul.f32 0.5, %v1404_v35  ;;  %v1382_v39 = vsel %vm1381_vm15, %v1619_v31, %v1378_v36 }
 0x63b   :  { %v1383_v42 = vmul.f32 %v1382_v39, %v2215_v47 }
 0x63c   :  { %v1406_v38 = vsub.f32 1.5, %v1405_v23 }
 0x63e   :  { %v1407_v50 = vmul.f32 %v1621_v33, %v1406_v38 }
 0x640   :  { %v1411_v41 = vsel %vm1410_vm0, %v1621_v33, %v1407_v50 }
 0x641   :  { %v1412_v43 = vmul.f32 %v1411_v41, %v2210_v46 }
 0x643   :  { %v1413_v44 = vadd.f32 %v1412_v43, %v1383_v42 }
 0x645   :  { %v1415_v51 = vmul.f32 %v1414_v49, %v1413_v44 }
 0x647   :  { %1448 = vmatmul.f32.vlgmr.msrb.gmra.mxu1 %v1415_v51 }
 0x6c4   :  { %v1449_v52 = vpop.f32.mrf.mxu1 }
 0x6c5   :  { %v1452_v53 = vadd.f32 %v1449_v52, %v1415_v51 }
 0x6c7   :  { %v1482_v54 = vsel %vm1481_vm1, %v1452_v53, -1e+30  ;;  %v1454_v55 = vsel %vm1453_vm3, %v1452_v53, -1e+30 }
 0x6c8   :  { %v1483_v56 = vsel %vm1357_vm7, %v1482_v54, -inf  ;;  %v1455_v45 = vsel %vm1357_vm7, %v1454_v55, -inf }
 0x6c9   :  { %1484 = vmax.xlane.f32.xlu2 %v1483_v56  ;;  %1456 = vmax.xlane.f32.xlu0 %v1455_v45 }
 0x73c   :  { %v1485_v57 = vpop.xlane.xlu2 %1484  ;;  %v1457_v58 = vpop.xlane.xlu0 %1456 }
 0x73d   :  { %v1486_v59 = vsub.f32 %v1482_v54, %v1485_v57  ;;  %v1458_v48 = vsub.f32 %v1454_v55, %v1457_v58 }
 0x73f   :  { %v1487_v60 = vmul.f32 1.442695, %v1486_v59  ;;  %v1459_v62 = vmul.f32 1.442695, %v1458_v48 }
 0x741   :  { %1622 = vpow2.f32 %v1487_v60 }
 0x742   :  { %1624 = vpow2.f32 %v1459_v62 }
 0x747   :  { %v1623_v4 = vpop.eup %1622 }
 0x748   :  { %v1625_v63 = vpop.eup %1624  ;;  %v1489_v0 = vmul.f32 %v1623_v4, %v2210_v46 }
 0x749   :  { %v1461_v3 = vmul.f32 %v1625_v63, %v2215_v47 }
 0x74a   :  { %v1490_v5 = vsel %vm1357_vm7, %v1489_v0, 0.0 }
 0x74b   :  { %1491 = vadd.xlane.f32.xlu0 %v1490_v5  ;;  %v1462_v6 = vsel %vm1357_vm7, %v1461_v3, 0.0 }
 0x74c   :  { %1463 = vadd.xlane.f32.xlu1 %v1462_v6 }
 0x7be   :  { %v1492_v7 = vpop.xlane.xlu0 %1491 }
 0x7bf   :  { %v1464_v9 = vpop.xlane.xlu1 %1463  ;;  %1626 = vrcp.f32 %v1492_v7  ;;  %v1504_v18 = vand.u32 2147483648, %v1492_v7  ;;  %v1502_v47 = vand.u32 2147483647, %v1492_v7  ;;  %vm1498_vm10 = vweird.f32 %v1492_v7 }
 0x7c0   :  { %1628 = vrcp.f32 %v1464_v9  ;;  %v1476_v46 = vand.u32 2147483648, %v1464_v9  ;;  %v1474_v8 = vand.u32 2147483647, %v1464_v9  ;;  %vm1470_vm12 = vweird.f32 %v1464_v9 }
 0x7c1   :  { %v1505_v21 = vor.u32 1.1754944e-38, %v1504_v18  ;;  %vm1503_vm4 = vcmp.eq.f32.partialorder %v1502_v47, 8.507059e+37 }
 0x7c2   :  { %v1477_v24 = vor.u32 1.1754944e-38, %v1476_v46  ;;  %vm1475_vm7 = vcmp.eq.f32.partialorder %v1474_v8, 8.507059e+37 }
 0x7c5   :  { %v1627_v11 = vpop.eup %1626 }
 0x7c6   :  { %v1629_v12 = vpop.eup %1628  ;;  %v1494_v13 = vmul.f32 %v1627_v11, %v1492_v7  ;;  %vm1499_vm6 = vweird.f32 %v1627_v11 }
 0x7c7   :  { %v1466_v14 = vmul.f32 %v1629_v12, %v1464_v9  ;;  %vm1471_vm9 = vweird.f32 %v1629_v12  ;;  %vm1500_vm14 = vmor %vm1498_vm10, %vm1499_vm6 }
 0x7c8   :  { %v1495_v15 = vsub.f32 1.0, %v1494_v13  ;;  %vm1472_vm2 = vmor %vm1470_vm12, %vm1471_vm9 }
 0x7c9   :  { %v1467_v16 = vsub.f32 1.0, %v1466_v14 }
 0x7ca   :  { %v1496_v25 = vmul.f32 %v1627_v11, %v1495_v15 }
 0x7cb   :  { %v1468_v17 = vmul.f32 %v1629_v12, %v1467_v16 }
 0x7cc   :  { %v1497_v19 = vadd.f32 %v1627_v11, %v1496_v25 }
 0x7cd   :  { %v1469_v22 = vadd.f32 %v1629_v12, %v1468_v17 }
 0x7ce   :  { %v1501_v1 = vsel %vm1500_vm14, %v1627_v11, %v1497_v19 }
 0x7cf   :  { %v1473_v26 = vsel %vm1472_vm2, %v1629_v12, %v1469_v22  ;;  %v1506_v27 = vsel %vm1503_vm4, %v1505_v21, %v1501_v1 }
 0x7d0   :  { %v1478_v28 = vsel %vm1475_vm7, %v1477_v24, %v1473_v26  ;;  %v1507_v29 = vmul.f32 %v1506_v27, %v1489_v0 }
 0x7d1   :  { %v1479_v30 = vmul.f32 %v1478_v28, %v1461_v3 }
 0x7d3   :  { %v1508_v31 = vadd.f32 %v1507_v29, %v1479_v30 }
 0x7d5   :  { %1509 = vst [vmem:[#allocation17] sm:$0x1] %v1508_v31 }
 0x7d6   :  { %1520 = dma.vmem_to_hbm [thread:$0]  %s1516_s9, 16, %s1518_s3, [#allocation10]  }
 0x7d7   :  { %1780 = dma.done.wait [#allocation10], 16  }
 0x7d8   :  { %1781 = vsyncadd [#allocation10], 4294967280 }
 0x7d9   :  { %1525 = vsyncpa [#allocation9], 1 }
 0x7da   :  { %1526 = vsyncpa [#allocation12], 1 }
 0x7db   :  { %1527 = vsyncpa [#allocation15], 1 }
 0x7dc   :  { %1528 = vsyncpa [#allocation10], 1 }

</bundles_post_ra>
